<compile_context>
chip_gen: v6e
topology: v6e:2x2x1
jax: 0.10.0
libtpu: 0.0.40
codegen_flags: <defaults>
</compile_context>

<pallas_src>
import jax
import jax.numpy as jnp
from jax.experimental import pallas as pl


def _ru128(x):
    """Round up to a whole 128-lane tile."""
    return ((x + 127) // 128) * 128


def _decoder_kernel(
    emb_ref,    # (T, E)            embedded phonemes (dropout == identity)
    h0_ref,     # (1, H)            initial hidden state
    enc_ref,    # (L, H)            encoder outputs
    wpre_ref,   # (E, LP + GP)      [w_attn_e | w_comb_e], lane-tile packed
    wh_ref,     # (H, LP + 3*GP)    [w_attn_h | w_hh_r | w_hh_z | w_hh_n]
    wx_ref,     # (H, 4*GP + V)     [w_comb_c | w_ih_r | w_ih_z | w_ih_n | w_out]
    bias_ref,   # (1, LP+GP+6*GP+V) [b_attn | b_comb | b_ih | b_hh | b_out]
    # outputs
    attn_ref,   # (T, L)            attention weights, all steps
    logp_ref,   # (1, V)            final log-probabilities
    hout_ref,   # (1, H)            final hidden state
):
    T = emb_ref.shape[0]
    L, H = enc_ref.shape
    V = logp_ref.shape[1]
    LP, GP = _ru128(L), _ru128(H)

    # Static bias-slab offsets (all multiples of 128 -> tile-aligned slices).
    o_pre = 0
    o_bih = LP + GP
    o_bhh = o_bih + 3 * GP
    o_bout = o_bhh + 3 * GP

    # Hoisted emb-only linears: one MXU push with M=T rows, off the recurrence
    # critical path.  pre[:, :L] is the attn-logit half, pre[:, LP:LP+H] the
    # attn_combine half.
    pre = (
        jnp.dot(emb_ref[...], wpre_ref[...], preferred_element_type=jnp.float32)
        + bias_ref[:, o_pre:o_pre + LP + GP]
    )                                                               # (T, LP+GP)

    enc = enc_ref[...]                                              # (L, H)
    b_ih = bias_ref[:, o_bih:o_bih + 3 * GP]                        # (1, 3GP)
    b_hh = bias_ref[:, o_bhh:o_bhh + 3 * GP]                        # (1, 3GP)

    h = h0_ref[...]                                                 # (1, H)
    attn_rows = []

    # Statically unrolled recurrence (T is a trace-time constant; live state
    # across steps is small, weights are re-loaded at point of use -> no spill).
    for t in range(T):
        # Everything that depends only on the previous h, in one fused MXU push
        # at the top of the step: attention logits AND all three hidden gates.
        hz = jnp.dot(h, wh_ref[...], preferred_element_type=jnp.float32)  # (1, LP+3GP)
        gh = hz[:, LP:] + b_hh                                      # (1, 3GP), tile-aligned

        # attn_weights = softmax(attn(cat([emb_t, h])))   (emb half in `pre`)
        logits = pre[t:t + 1, :L] + hz[:, :L]                       # (1, L)
        logits = logits - jnp.max(logits, axis=-1, keepdims=True)
        p = jnp.exp(logits)
        attn_w = p / jnp.sum(p, axis=-1, keepdims=True)             # exact divide
        attn_rows.append(attn_w)

        # attn_applied = attn_weights @ encoder_outputs
        ctx = jnp.dot(attn_w, enc, preferred_element_type=jnp.float32)    # (1, H)

        # x = attn_combine(cat([emb_t, ctx]))             (emb half in `pre`)
        x = pre[t:t + 1, LP:LP + H] + jnp.dot(
            ctx, wx_ref[:, 0:H], preferred_element_type=jnp.float32)      # (1, H)

        # GRU cell (PyTorch gate order r, z, n); every gate slice is vreg-aligned.
        gi = jnp.dot(x, wx_ref[:, GP:4 * GP],
                     preferred_element_type=jnp.float32) + b_ih           # (1, 3GP)
        r = jax.nn.sigmoid(gi[:, 0:GP] + gh[:, 0:GP])
        z = jax.nn.sigmoid(gi[:, GP:2 * GP] + gh[:, GP:2 * GP])
        n = jnp.tanh(gi[:, 2 * GP:3 * GP] + r * gh[:, 2 * GP:3 * GP])
        zh = z[:, :H]
        h = (1.0 - zh) * n[:, :H] + zh * h

    # Single writeback of all attention rows (one store instead of T masked ones).
    attn_ref[...] = jnp.concatenate(attn_rows, axis=0)              # (T, L)
    hout_ref[...] = h

    # output = log_softmax(word_out(h))
    wl = (
        jnp.dot(h, wx_ref[:, 4 * GP:4 * GP + V], preferred_element_type=jnp.float32)
        + bias_ref[:, o_bout:o_bout + V]
    )
    s = wl - jnp.max(wl, axis=-1, keepdims=True)
    logp_ref[...] = s - jnp.log(jnp.sum(jnp.exp(s), axis=-1, keepdims=True))


def prepare_decoder_params(params):
    """Pack raw per-layer weights into lane-aligned slabs ONCE (not per call)."""
    H, L = params["w_attn_h"].shape
    V = params["w_out"].shape[1]
    LP, GP = _ru128(L), _ru128(H)

    def padc(w, width):  # zero-pad columns up to a lane-tile width
        return jnp.pad(w, ((0, 0), (0, width - w.shape[1])))

    w_pre = jnp.concatenate(
        [padc(params["w_attn_e"], LP), padc(params["w_comb_e"], GP)], axis=1)
    w_h = jnp.concatenate(
        [padc(params["w_attn_h"], LP)]
        + [padc(params["w_hh"][g], GP) for g in range(3)], axis=1)
    w_x = jnp.concatenate(
        [padc(params["w_comb_c"], GP)]
        + [padc(params["w_ih"][g], GP) for g in range(3)]
        + [params["w_out"]], axis=1)
    b_all = jnp.concatenate(
        [padc(params["b_attn"], LP), padc(params["b_comb"], GP)]
        + [padc(params["b_ih"][g], GP) for g in range(3)]
        + [padc(params["b_hh"][g], GP) for g in range(3)]
        + [params["b_out"]], axis=1)

    # NOTE: weights could also be stored in bfloat16 (f32 MXU accumulation kept)
    # to halve weight bytes; kept f32 here for exact parity with the reference.
    return {
        "embedding": params["embedding"],
        "w_pre": w_pre, "w_h": w_h, "w_x": w_x, "b_all": b_all,
        "hidden": H, "max_len": L, "vocab": V,
    }


def decoder_rnn_forward(phos, hidden, encoder_outputs, packed):
    """phos: (T,) int32 phoneme ids, hidden: (1,1,H), encoder_outputs: (L,H)."""
    T = phos.shape[0]
    L, H = encoder_outputs.shape
    V = packed["vocab"]

    # Per-call glue is only the embedding gather + reshape (weights are packed
    # once in prepare_decoder_params).
    emb = packed["embedding"][phos]                                  # (T, E)
    h0 = hidden.reshape(1, H)

    attn_all, logp, h_final = pl.pallas_call(
        _decoder_kernel,
        out_shape=[
            jax.ShapeDtypeStruct((T, L), jnp.float32),   # attention, all steps
            jax.ShapeDtypeStruct((1, V), jnp.float32),   # final log-probs
            jax.ShapeDtypeStruct((1, H), jnp.float32),   # final hidden
        ],
    )(emb, h0, encoder_outputs,
      packed["w_pre"], packed["w_h"], packed["w_x"], packed["b_all"])

    output = logp                           # (1, V)  log_softmax(word_out(h_T))
    pho_hidden = h_final.reshape(1, 1, H)   # (1, 1, H)
    attn_weights = attn_all[-1:]            # (1, L)  last step's attention
    return output, pho_hidden, attn_weights, attn_all


def _reference_forward(phos, hidden, encoder_outputs, params):
    """Pure-JAX reference mirroring the PyTorch forward (eval mode)."""
    h_new = hidden.reshape(1, -1)
    attn_w = None
    for t in range(phos.shape[0]):
        emb = params["embedding"][phos[t]][None, :]
        logits = emb @ params["w_attn_e"] + h_new @ params["w_attn_h"] + params["b_attn"]
        attn_w = jax.nn.softmax(logits, axis=-1)
        ctx = attn_w @ encoder_outputs
        x = emb @ params["w_comb_e"] + ctx @ params["w_comb_c"] + params["b_comb"]
        gi = [x @ params["w_ih"][i] + params["b_ih"][i] for i in range(3)]
        gh = [h_new @ params["w_hh"][i] + params["b_hh"][i] for i in range(3)]
        r = jax.nn.sigmoid(gi[0] + gh[0])
        z = jax.nn.sigmoid(gi[1] + gh[1])
        n = jnp.tanh(gi[2] + r * gh[2])
        h_new = (1.0 - z) * n + z * h_new
    out = jax.nn.log_softmax(h_new @ params["w_out"] + params["b_out"], axis=-1)
    return out, h_new.reshape(1, 1, -1), attn_w


def init_params(key, total_phonemes, total_words, E, H, max_len):
    ks = jax.random.split(key, 12)
    u = lambda k, shape, s: jax.random.uniform(k, shape, jnp.float32, -s, s)
    return {
        "embedding": u(ks[0], (total_phonemes, E), 1.0),
        "w_attn_e": u(ks[1], (E, max_len), 0.1),
        "w_attn_h": u(ks[2], (H, max_len), 0.1),
        "b_attn":   u(ks[3], (1, max_len), 0.1),
        "w_comb_e": u(ks[4], (E, H), 0.1),
        "w_comb_c": u(ks[5], (H, H), 0.1),
        "b_comb":   u(ks[6], (1, H), 0.1),
        "w_ih":     u(ks[7], (3, H, H), 0.2),
        "w_hh":     u(ks[8], (3, H, H), 0.2),
        "b_ih":     u(ks[9], (3, 1, H), 0.2),
        "b_hh":     u(ks[10], (3, 1, H), 0.2),
        "w_out":    u(ks[11], (H, total_words), 0.1),
        "b_out":    jnp.zeros((1, total_words), jnp.float32),
    }


if __name__ == "__main__":
    total_phonemes, total_words = 24, 48
    E, H, max_len, T = 32, 32, 16, 6

    key = jax.random.PRNGKey(0)
    kp, kph, kh, ke = jax.random.split(key, 4)
    params = init_params(kp, total_phonemes, total_words, E, H, max_len)
    packed = prepare_decoder_params(params)     # one-time weight packing

    phos = jax.random.randint(kph, (T,), 0, total_phonemes, dtype=jnp.int32)
    hidden0 = jax.random.normal(kh, (1, 1, H), jnp.float32) * 0.1
    encoder_outputs = jax.random.normal(ke, (max_len, H), jnp.float32) * 0.5

    output, pho_hidden, attn_weights, attn_all = jax.block_until_ready(
        decoder_rnn_forward(phos, hidden0, encoder_outputs, packed)
    )

    ref_out, ref_h, ref_attn = _reference_forward(phos, hidden0, encoder_outputs, params)
    assert output.shape == (1, total_words)
    assert pho_hidden.shape == (1, 1, H)
    assert attn_weights.shape == (1, max_len)
    assert attn_all.shape == (T, max_len)
    assert jnp.allclose(output, ref_out, atol=2e-3, rtol=2e-3)
    assert jnp.allclose(pho_hidden, ref_h, atol=2e-3, rtol=2e-3)
    assert jnp.allclose(attn_weights, ref_attn, atol=2e-3, rtol=2e-3)

    print("KERNEL_OK")
</pallas_src>

<mosaic_0001>
module attributes {stable_mosaic.version = 11 : i64} {
  func.func @_decoder_kernel(%arg0: memref<6x32xf32, #tpu.memory_space<vmem>>, %arg1: memref<1x32xf32, #tpu.memory_space<vmem>>, %arg2: memref<16x32xf32, #tpu.memory_space<vmem>>, %arg3: memref<32x256xf32, #tpu.memory_space<vmem>>, %arg4: memref<32x512xf32, #tpu.memory_space<vmem>>, %arg5: memref<32x560xf32, #tpu.memory_space<vmem>>, %arg6: memref<1x1072xf32, #tpu.memory_space<vmem>>, %arg7: memref<6x16xf32, #tpu.memory_space<vmem>>, %arg8: memref<1x48xf32, #tpu.memory_space<vmem>>, %arg9: memref<1x32xf32, #tpu.memory_space<vmem>>) attributes {dimension_semantics = [], scalar_prefetch = 0 : i64, scratch_operands = 0 : i64, tpu.core_type = #tpu.core_type<tc>} {
    %c0 = arith.constant 0 : index
    %c0_0 = arith.constant 0 : index
    %0 = vector.load %arg0[%c0, %c0_0] : memref<6x32xf32, #tpu.memory_space<vmem>>, vector<6x32xf32>
    %c0_1 = arith.constant 0 : index
    %c0_2 = arith.constant 0 : index
    %1 = vector.load %arg3[%c0_1, %c0_2] : memref<32x256xf32, #tpu.memory_space<vmem>>, vector<32x256xf32>
    %cst = arith.constant dense<0.000000e+00> : vector<6x256xf32>
    %2 = tpu.matmul %0, %1, %cst {dimension_numbers = #tpu.dot_dimension_numbers<[1], [0], [0], [1], [0, 0, 1, 1], [], []>} : vector<6x32xf32>, vector<32x256xf32>, vector<6x256xf32> -> vector<6x256xf32>
    %c0_3 = arith.constant 0 : index
    %c0_4 = arith.constant 0 : index
    %3 = vector.load %arg6[%c0_3, %c0_4] : memref<1x1072xf32, #tpu.memory_space<vmem>>, vector<1x256xf32>
    %4 = vector.broadcast %3 : vector<1x256xf32> to vector<6x256xf32>
    %5 = arith.addf %2, %4 : vector<6x256xf32>
    %c0_5 = arith.constant 0 : index
    %c0_6 = arith.constant 0 : index
    %6 = vector.load %arg2[%c0_5, %c0_6] : memref<16x32xf32, #tpu.memory_space<vmem>>, vector<16x32xf32>
    %c0_7 = arith.constant 0 : index
    %c256 = arith.constant 256 : index
    %7 = vector.load %arg6[%c0_7, %c256] : memref<1x1072xf32, #tpu.memory_space<vmem>>, vector<1x384xf32>
    %c0_8 = arith.constant 0 : index
    %c640 = arith.constant 640 : index
    %8 = vector.load %arg6[%c0_8, %c640] : memref<1x1072xf32, #tpu.memory_space<vmem>>, vector<1x384xf32>
    %c0_9 = arith.constant 0 : index
    %c0_10 = arith.constant 0 : index
    %9 = vector.load %arg1[%c0_9, %c0_10] : memref<1x32xf32, #tpu.memory_space<vmem>>, vector<1x32xf32>
    %c0_11 = arith.constant 0 : index
    %c0_12 = arith.constant 0 : index
    %10 = vector.load %arg4[%c0_11, %c0_12] : memref<32x512xf32, #tpu.memory_space<vmem>>, vector<32x512xf32>
    %cst_13 = arith.constant dense<0.000000e+00> : vector<1x512xf32>
    %11 = tpu.matmul %9, %10, %cst_13 {dimension_numbers = #tpu.dot_dimension_numbers<[1], [0], [0], [1], [0, 0, 1, 1], [], []>} : vector<1x32xf32>, vector<32x512xf32>, vector<1x512xf32> -> vector<1x512xf32>
    %12 = vector.extract_strided_slice %11 {offsets = [0, 128], sizes = [1, 384], strides = [1, 1]} : vector<1x512xf32> to vector<1x384xf32>
    %13 = arith.addf %12, %8 : vector<1x384xf32>
    %14 = vector.extract_strided_slice %5 {offsets = [0, 0], sizes = [1, 16], strides = [1, 1]} : vector<6x256xf32> to vector<1x16xf32>
    %15 = vector.extract_strided_slice %11 {offsets = [0, 0], sizes = [1, 16], strides = [1, 1]} : vector<1x512xf32> to vector<1x16xf32>
    %16 = arith.addf %14, %15 : vector<1x16xf32>
    %cst_14 = arith.constant dense<0xFF800000> : vector<1xf32>
    %17 = vector.multi_reduction <maximumf>, %16, %cst_14 [1] : vector<1x16xf32> to vector<1xf32>
    %18 = vector.shape_cast %17 : vector<1xf32> to vector<1x1xf32>
    %19 = vector.broadcast %18 : vector<1x1xf32> to vector<1x16xf32>
    %20 = arith.subf %16, %19 : vector<1x16xf32>
    %21 = math.exp %20 : vector<1x16xf32>
    %cst_15 = arith.constant dense<0.000000e+00> : vector<1xf32>
    %22 = vector.multi_reduction <add>, %21, %cst_15 [1] : vector<1x16xf32> to vector<1xf32>
    %23 = vector.shape_cast %22 : vector<1xf32> to vector<1x1xf32>
    %24 = vector.broadcast %23 : vector<1x1xf32> to vector<1x16xf32>
    %25 = arith.divf %21, %24 : vector<1x16xf32>
    %cst_16 = arith.constant dense<0.000000e+00> : vector<1x32xf32>
    %26 = tpu.matmul %25, %6, %cst_16 {dimension_numbers = #tpu.dot_dimension_numbers<[1], [0], [0], [1], [0, 0, 1, 1], [], []>} : vector<1x16xf32>, vector<16x32xf32>, vector<1x32xf32> -> vector<1x32xf32>
    %27 = vector.extract_strided_slice %5 {offsets = [0, 128], sizes = [1, 32], strides = [1, 1]} : vector<6x256xf32> to vector<1x32xf32>
    %c0_17 = arith.constant 0 : index
    %c0_18 = arith.constant 0 : index
    %28 = vector.load %arg5[%c0_17, %c0_18] : memref<32x560xf32, #tpu.memory_space<vmem>>, vector<32x32xf32>
    %cst_19 = arith.constant dense<0.000000e+00> : vector<1x32xf32>
    %29 = tpu.matmul %26, %28, %cst_19 {dimension_numbers = #tpu.dot_dimension_numbers<[1], [0], [0], [1], [0, 0, 1, 1], [], []>} : vector<1x32xf32>, vector<32x32xf32>, vector<1x32xf32> -> vector<1x32xf32>
    %30 = arith.addf %27, %29 : vector<1x32xf32>
    %c0_20 = arith.constant 0 : index
    %c128 = arith.constant 128 : index
    %31 = vector.load %arg5[%c0_20, %c128] : memref<32x560xf32, #tpu.memory_space<vmem>>, vector<32x384xf32>
    %cst_21 = arith.constant dense<0.000000e+00> : vector<1x384xf32>
    %32 = tpu.matmul %30, %31, %cst_21 {dimension_numbers = #tpu.dot_dimension_numbers<[1], [0], [0], [1], [0, 0, 1, 1], [], []>} : vector<1x32xf32>, vector<32x384xf32>, vector<1x384xf32> -> vector<1x384xf32>
    %33 = arith.addf %32, %7 : vector<1x384xf32>
    %34 = vector.extract_strided_slice %33 {offsets = [0, 0], sizes = [1, 128], strides = [1, 1]} : vector<1x384xf32> to vector<1x128xf32>
    %35 = vector.extract_strided_slice %13 {offsets = [0, 0], sizes = [1, 128], strides = [1, 1]} : vector<1x384xf32> to vector<1x128xf32>
    %36 = arith.addf %34, %35 : vector<1x128xf32>
    %37 = arith.negf %36 : vector<1x128xf32>
    %38 = math.exp %37 : vector<1x128xf32>
    %cst_22 = arith.constant 1.000000e+00 : f32
    %39 = vector.broadcast %cst_22 : f32 to vector<1x128xf32>
    %40 = arith.addf %39, %38 : vector<1x128xf32>
    %41 = arith.divf %39, %40 : vector<1x128xf32>
    %42 = vector.extract_strided_slice %33 {offsets = [0, 128], sizes = [1, 128], strides = [1, 1]} : vector<1x384xf32> to vector<1x128xf32>
    %43 = vector.extract_strided_slice %13 {offsets = [0, 128], sizes = [1, 128], strides = [1, 1]} : vector<1x384xf32> to vector<1x128xf32>
    %44 = arith.addf %42, %43 : vector<1x128xf32>
    %45 = arith.negf %44 : vector<1x128xf32>
    %46 = math.exp %45 : vector<1x128xf32>
    %cst_23 = arith.constant 1.000000e+00 : f32
    %47 = vector.broadcast %cst_23 : f32 to vector<1x128xf32>
    %48 = arith.addf %47, %46 : vector<1x128xf32>
    %49 = arith.divf %47, %48 : vector<1x128xf32>
    %50 = vector.extract_strided_slice %33 {offsets = [0, 256], sizes = [1, 128], strides = [1, 1]} : vector<1x384xf32> to vector<1x128xf32>
    %51 = vector.extract_strided_slice %13 {offsets = [0, 256], sizes = [1, 128], strides = [1, 1]} : vector<1x384xf32> to vector<1x128xf32>
    %52 = arith.mulf %41, %51 : vector<1x128xf32>
    %53 = arith.addf %50, %52 : vector<1x128xf32>
    %54 = math.tanh %53 : vector<1x128xf32>
    %55 = vector.extract_strided_slice %49 {offsets = [0, 0], sizes = [1, 32], strides = [1, 1]} : vector<1x128xf32> to vector<1x32xf32>
    %cst_24 = arith.constant 1.000000e+00 : f32
    %56 = vector.broadcast %cst_24 : f32 to vector<1x32xf32>
    %57 = arith.subf %56, %55 : vector<1x32xf32>
    %58 = vector.extract_strided_slice %54 {offsets = [0, 0], sizes = [1, 32], strides = [1, 1]} : vector<1x128xf32> to vector<1x32xf32>
    %59 = arith.mulf %57, %58 : vector<1x32xf32>
    %60 = arith.mulf %55, %9 : vector<1x32xf32>
    %61 = arith.addf %59, %60 : vector<1x32xf32>
    %c0_25 = arith.constant 0 : index
    %c0_26 = arith.constant 0 : index
    %62 = vector.load %arg4[%c0_25, %c0_26] : memref<32x512xf32, #tpu.memory_space<vmem>>, vector<32x512xf32>
    %cst_27 = arith.constant dense<0.000000e+00> : vector<1x512xf32>
    %63 = tpu.matmul %61, %62, %cst_27 {dimension_numbers = #tpu.dot_dimension_numbers<[1], [0], [0], [1], [0, 0, 1, 1], [], []>} : vector<1x32xf32>, vector<32x512xf32>, vector<1x512xf32> -> vector<1x512xf32>
    %64 = vector.extract_strided_slice %63 {offsets = [0, 128], sizes = [1, 384], strides = [1, 1]} : vector<1x512xf32> to vector<1x384xf32>
    %65 = arith.addf %64, %8 : vector<1x384xf32>
    %66 = vector.extract_strided_slice %5 {offsets = [1, 0], sizes = [1, 16], strides = [1, 1]} : vector<6x256xf32> to vector<1x16xf32>
    %67 = vector.extract_strided_slice %63 {offsets = [0, 0], sizes = [1, 16], strides = [1, 1]} : vector<1x512xf32> to vector<1x16xf32>
    %68 = arith.addf %66, %67 : vector<1x16xf32>
    %cst_28 = arith.constant dense<0xFF800000> : vector<1xf32>
    %69 = vector.multi_reduction <maximumf>, %68, %cst_28 [1] : vector<1x16xf32> to vector<1xf32>
    %70 = vector.shape_cast %69 : vector<1xf32> to vector<1x1xf32>
    %71 = vector.broadcast %70 : vector<1x1xf32> to vector<1x16xf32>
    %72 = arith.subf %68, %71 : vector<1x16xf32>
    %73 = math.exp %72 : vector<1x16xf32>
    %cst_29 = arith.constant dense<0.000000e+00> : vector<1xf32>
    %74 = vector.multi_reduction <add>, %73, %cst_29 [1] : vector<1x16xf32> to vector<1xf32>
    %75 = vector.shape_cast %74 : vector<1xf32> to vector<1x1xf32>
    %76 = vector.broadcast %75 : vector<1x1xf32> to vector<1x16xf32>
    %77 = arith.divf %73, %76 : vector<1x16xf32>
    %cst_30 = arith.constant dense<0.000000e+00> : vector<1x32xf32>
    %78 = tpu.matmul %77, %6, %cst_30 {dimension_numbers = #tpu.dot_dimension_numbers<[1], [0], [0], [1], [0, 0, 1, 1], [], []>} : vector<1x16xf32>, vector<16x32xf32>, vector<1x32xf32> -> vector<1x32xf32>
    %79 = vector.extract_strided_slice %5 {offsets = [1, 128], sizes = [1, 32], strides = [1, 1]} : vector<6x256xf32> to vector<1x32xf32>
    %c0_31 = arith.constant 0 : index
    %c0_32 = arith.constant 0 : index
    %80 = vector.load %arg5[%c0_31, %c0_32] : memref<32x560xf32, #tpu.memory_space<vmem>>, vector<32x32xf32>
    %cst_33 = arith.constant dense<0.000000e+00> : vector<1x32xf32>
    %81 = tpu.matmul %78, %80, %cst_33 {dimension_numbers = #tpu.dot_dimension_numbers<[1], [0], [0], [1], [0, 0, 1, 1], [], []>} : vector<1x32xf32>, vector<32x32xf32>, vector<1x32xf32> -> vector<1x32xf32>
    %82 = arith.addf %79, %81 : vector<1x32xf32>
    %c0_34 = arith.constant 0 : index
    %c128_35 = arith.constant 128 : index
    %83 = vector.load %arg5[%c0_34, %c128_35] : memref<32x560xf32, #tpu.memory_space<vmem>>, vector<32x384xf32>
    %cst_36 = arith.constant dense<0.000000e+00> : vector<1x384xf32>
    %84 = tpu.matmul %82, %83, %cst_36 {dimension_numbers = #tpu.dot_dimension_numbers<[1], [0], [0], [1], [0, 0, 1, 1], [], []>} : vector<1x32xf32>, vector<32x384xf32>, vector<1x384xf32> -> vector<1x384xf32>
    %85 = arith.addf %84, %7 : vector<1x384xf32>
    %86 = vector.extract_strided_slice %85 {offsets = [0, 0], sizes = [1, 128], strides = [1, 1]} : vector<1x384xf32> to vector<1x128xf32>
    %87 = vector.extract_strided_slice %65 {offsets = [0, 0], sizes = [1, 128], strides = [1, 1]} : vector<1x384xf32> to vector<1x128xf32>
    %88 = arith.addf %86, %87 : vector<1x128xf32>
    %89 = arith.negf %88 : vector<1x128xf32>
    %90 = math.exp %89 : vector<1x128xf32>
    %cst_37 = arith.constant 1.000000e+00 : f32
    %91 = vector.broadcast %cst_37 : f32 to vector<1x128xf32>
    %92 = arith.addf %91, %90 : vector<1x128xf32>
    %93 = arith.divf %91, %92 : vector<1x128xf32>
    %94 = vector.extract_strided_slice %85 {offsets = [0, 128], sizes = [1, 128], strides = [1, 1]} : vector<1x384xf32> to vector<1x128xf32>
    %95 = vector.extract_strided_slice %65 {offsets = [0, 128], sizes = [1, 128], strides = [1, 1]} : vector<1x384xf32> to vector<1x128xf32>
    %96 = arith.addf %94, %95 : vector<1x128xf32>
    %97 = arith.negf %96 : vector<1x128xf32>
    %98 = math.exp %97 : vector<1x128xf32>
    %cst_38 = arith.constant 1.000000e+00 : f32
    %99 = vector.broadcast %cst_38 : f32 to vector<1x128xf32>
    %100 = arith.addf %99, %98 : vector<1x128xf32>
    %101 = arith.divf %99, %100 : vector<1x128xf32>
    %102 = vector.extract_strided_slice %85 {offsets = [0, 256], sizes = [1, 128], strides = [1, 1]} : vector<1x384xf32> to vector<1x128xf32>
    %103 = vector.extract_strided_slice %65 {offsets = [0, 256], sizes = [1, 128], strides = [1, 1]} : vector<1x384xf32> to vector<1x128xf32>
    %104 = arith.mulf %93, %103 : vector<1x128xf32>
    %105 = arith.addf %102, %104 : vector<1x128xf32>
    %106 = math.tanh %105 : vector<1x128xf32>
    %107 = vector.extract_strided_slice %101 {offsets = [0, 0], sizes = [1, 32], strides = [1, 1]} : vector<1x128xf32> to vector<1x32xf32>
    %cst_39 = arith.constant 1.000000e+00 : f32
    %108 = vector.broadcast %cst_39 : f32 to vector<1x32xf32>
    %109 = arith.subf %108, %107 : vector<1x32xf32>
    %110 = vector.extract_strided_slice %106 {offsets = [0, 0], sizes = [1, 32], strides = [1, 1]} : vector<1x128xf32> to vector<1x32xf32>
    %111 = arith.mulf %109, %110 : vector<1x32xf32>
    %112 = arith.mulf %107, %61 : vector<1x32xf32>
    %113 = arith.addf %111, %112 : vector<1x32xf32>
    %c0_40 = arith.constant 0 : index
    %c0_41 = arith.constant 0 : index
    %114 = vector.load %arg4[%c0_40, %c0_41] : memref<32x512xf32, #tpu.memory_space<vmem>>, vector<32x512xf32>
    %cst_42 = arith.constant dense<0.000000e+00> : vector<1x512xf32>
    %115 = tpu.matmul %113, %114, %cst_42 {dimension_numbers = #tpu.dot_dimension_numbers<[1], [0], [0], [1], [0, 0, 1, 1], [], []>} : vector<1x32xf32>, vector<32x512xf32>, vector<1x512xf32> -> vector<1x512xf32>
    %116 = vector.extract_strided_slice %115 {offsets = [0, 128], sizes = [1, 384], strides = [1, 1]} : vector<1x512xf32> to vector<1x384xf32>
    %117 = arith.addf %116, %8 : vector<1x384xf32>
    %118 = vector.extract_strided_slice %5 {offsets = [2, 0], sizes = [1, 16], strides = [1, 1]} : vector<6x256xf32> to vector<1x16xf32>
    %119 = vector.extract_strided_slice %115 {offsets = [0, 0], sizes = [1, 16], strides = [1, 1]} : vector<1x512xf32> to vector<1x16xf32>
    %120 = arith.addf %118, %119 : vector<1x16xf32>
    %cst_43 = arith.constant dense<0xFF800000> : vector<1xf32>
    %121 = vector.multi_reduction <maximumf>, %120, %cst_43 [1] : vector<1x16xf32> to vector<1xf32>
    %122 = vector.shape_cast %121 : vector<1xf32> to vector<1x1xf32>
    %123 = vector.broadcast %122 : vector<1x1xf32> to vector<1x16xf32>
    %124 = arith.subf %120, %123 : vector<1x16xf32>
    %125 = math.exp %124 : vector<1x16xf32>
    %cst_44 = arith.constant dense<0.000000e+00> : vector<1xf32>
    %126 = vector.multi_reduction <add>, %125, %cst_44 [1] : vector<1x16xf32> to vector<1xf32>
    %127 = vector.shape_cast %126 : vector<1xf32> to vector<1x1xf32>
    %128 = vector.broadcast %127 : vector<1x1xf32> to vector<1x16xf32>
    %129 = arith.divf %125, %128 : vector<1x16xf32>
    %cst_45 = arith.constant dense<0.000000e+00> : vector<1x32xf32>
    %130 = tpu.matmul %129, %6, %cst_45 {dimension_numbers = #tpu.dot_dimension_numbers<[1], [0], [0], [1], [0, 0, 1, 1], [], []>} : vector<1x16xf32>, vector<16x32xf32>, vector<1x32xf32> -> vector<1x32xf32>
    %131 = vector.extract_strided_slice %5 {offsets = [2, 128], sizes = [1, 32], strides = [1, 1]} : vector<6x256xf32> to vector<1x32xf32>
    %c0_46 = arith.constant 0 : index
    %c0_47 = arith.constant 0 : index
    %132 = vector.load %arg5[%c0_46, %c0_47] : memref<32x560xf32, #tpu.memory_space<vmem>>, vector<32x32xf32>
    %cst_48 = arith.constant dense<0.000000e+00> : vector<1x32xf32>
    %133 = tpu.matmul %130, %132, %cst_48 {dimension_numbers = #tpu.dot_dimension_numbers<[1], [0], [0], [1], [0, 0, 1, 1], [], []>} : vector<1x32xf32>, vector<32x32xf32>, vector<1x32xf32> -> vector<1x32xf32>
    %134 = arith.addf %131, %133 : vector<1x32xf32>
    %c0_49 = arith.constant 0 : index
    %c128_50 = arith.constant 128 : index
    %135 = vector.load %arg5[%c0_49, %c128_50] : memref<32x560xf32, #tpu.memory_space<vmem>>, vector<32x384xf32>
    %cst_51 = arith.constant dense<0.000000e+00> : vector<1x384xf32>
    %136 = tpu.matmul %134, %135, %cst_51 {dimension_numbers = #tpu.dot_dimension_numbers<[1], [0], [0], [1], [0, 0, 1, 1], [], []>} : vector<1x32xf32>, vector<32x384xf32>, vector<1x384xf32> -> vector<1x384xf32>
    %137 = arith.addf %136, %7 : vector<1x384xf32>
    %138 = vector.extract_strided_slice %137 {offsets = [0, 0], sizes = [1, 128], strides = [1, 1]} : vector<1x384xf32> to vector<1x128xf32>
    %139 = vector.extract_strided_slice %117 {offsets = [0, 0], sizes = [1, 128], strides = [1, 1]} : vector<1x384xf32> to vector<1x128xf32>
    %140 = arith.addf %138, %139 : vector<1x128xf32>
    %141 = arith.negf %140 : vector<1x128xf32>
    %142 = math.exp %141 : vector<1x128xf32>
    %cst_52 = arith.constant 1.000000e+00 : f32
    %143 = vector.broadcast %cst_52 : f32 to vector<1x128xf32>
    %144 = arith.addf %143, %142 : vector<1x128xf32>
    %145 = arith.divf %143, %144 : vector<1x128xf32>
    %146 = vector.extract_strided_slice %137 {offsets = [0, 128], sizes = [1, 128], strides = [1, 1]} : vector<1x384xf32> to vector<1x128xf32>
    %147 = vector.extract_strided_slice %117 {offsets = [0, 128], sizes = [1, 128], strides = [1, 1]} : vector<1x384xf32> to vector<1x128xf32>
    %148 = arith.addf %146, %147 : vector<1x128xf32>
    %149 = arith.negf %148 : vector<1x128xf32>
    %150 = math.exp %149 : vector<1x128xf32>
    %cst_53 = arith.constant 1.000000e+00 : f32
    %151 = vector.broadcast %cst_53 : f32 to vector<1x128xf32>
    %152 = arith.addf %151, %150 : vector<1x128xf32>
    %153 = arith.divf %151, %152 : vector<1x128xf32>
    %154 = vector.extract_strided_slice %137 {offsets = [0, 256], sizes = [1, 128], strides = [1, 1]} : vector<1x384xf32> to vector<1x128xf32>
    %155 = vector.extract_strided_slice %117 {offsets = [0, 256], sizes = [1, 128], strides = [1, 1]} : vector<1x384xf32> to vector<1x128xf32>
    %156 = arith.mulf %145, %155 : vector<1x128xf32>
    %157 = arith.addf %154, %156 : vector<1x128xf32>
    %158 = math.tanh %157 : vector<1x128xf32>
    %159 = vector.extract_strided_slice %153 {offsets = [0, 0], sizes = [1, 32], strides = [1, 1]} : vector<1x128xf32> to vector<1x32xf32>
    %cst_54 = arith.constant 1.000000e+00 : f32
    %160 = vector.broadcast %cst_54 : f32 to vector<1x32xf32>
    %161 = arith.subf %160, %159 : vector<1x32xf32>
    %162 = vector.extract_strided_slice %158 {offsets = [0, 0], sizes = [1, 32], strides = [1, 1]} : vector<1x128xf32> to vector<1x32xf32>
    %163 = arith.mulf %161, %162 : vector<1x32xf32>
    %164 = arith.mulf %159, %113 : vector<1x32xf32>
    %165 = arith.addf %163, %164 : vector<1x32xf32>
    %c0_55 = arith.constant 0 : index
    %c0_56 = arith.constant 0 : index
    %166 = vector.load %arg4[%c0_55, %c0_56] : memref<32x512xf32, #tpu.memory_space<vmem>>, vector<32x512xf32>
    %cst_57 = arith.constant dense<0.000000e+00> : vector<1x512xf32>
    %167 = tpu.matmul %165, %166, %cst_57 {dimension_numbers = #tpu.dot_dimension_numbers<[1], [0], [0], [1], [0, 0, 1, 1], [], []>} : vector<1x32xf32>, vector<32x512xf32>, vector<1x512xf32> -> vector<1x512xf32>
    %168 = vector.extract_strided_slice %167 {offsets = [0, 128], sizes = [1, 384], strides = [1, 1]} : vector<1x512xf32> to vector<1x384xf32>
    %169 = arith.addf %168, %8 : vector<1x384xf32>
    %170 = vector.extract_strided_slice %5 {offsets = [3, 0], sizes = [1, 16], strides = [1, 1]} : vector<6x256xf32> to vector<1x16xf32>
    %171 = vector.extract_strided_slice %167 {offsets = [0, 0], sizes = [1, 16], strides = [1, 1]} : vector<1x512xf32> to vector<1x16xf32>
    %172 = arith.addf %170, %171 : vector<1x16xf32>
    %cst_58 = arith.constant dense<0xFF800000> : vector<1xf32>
    %173 = vector.multi_reduction <maximumf>, %172, %cst_58 [1] : vector<1x16xf32> to vector<1xf32>
    %174 = vector.shape_cast %173 : vector<1xf32> to vector<1x1xf32>
    %175 = vector.broadcast %174 : vector<1x1xf32> to vector<1x16xf32>
    %176 = arith.subf %172, %175 : vector<1x16xf32>
    %177 = math.exp %176 : vector<1x16xf32>
    %cst_59 = arith.constant dense<0.000000e+00> : vector<1xf32>
    %178 = vector.multi_reduction <add>, %177, %cst_59 [1] : vector<1x16xf32> to vector<1xf32>
    %179 = vector.shape_cast %178 : vector<1xf32> to vector<1x1xf32>
    %180 = vector.broadcast %179 : vector<1x1xf32> to vector<1x16xf32>
    %181 = arith.divf %177, %180 : vector<1x16xf32>
    %cst_60 = arith.constant dense<0.000000e+00> : vector<1x32xf32>
    %182 = tpu.matmul %181, %6, %cst_60 {dimension_numbers = #tpu.dot_dimension_numbers<[1], [0], [0], [1], [0, 0, 1, 1], [], []>} : vector<1x16xf32>, vector<16x32xf32>, vector<1x32xf32> -> vector<1x32xf32>
    %183 = vector.extract_strided_slice %5 {offsets = [3, 128], sizes = [1, 32], strides = [1, 1]} : vector<6x256xf32> to vector<1x32xf32>
    %c0_61 = arith.constant 0 : index
    %c0_62 = arith.constant 0 : index
    %184 = vector.load %arg5[%c0_61, %c0_62] : memref<32x560xf32, #tpu.memory_space<vmem>>, vector<32x32xf32>
    %cst_63 = arith.constant dense<0.000000e+00> : vector<1x32xf32>
    %185 = tpu.matmul %182, %184, %cst_63 {dimension_numbers = #tpu.dot_dimension_numbers<[1], [0], [0], [1], [0, 0, 1, 1], [], []>} : vector<1x32xf32>, vector<32x32xf32>, vector<1x32xf32> -> vector<1x32xf32>
    %186 = arith.addf %183, %185 : vector<1x32xf32>
    %c0_64 = arith.constant 0 : index
    %c128_65 = arith.constant 128 : index
    %187 = vector.load %arg5[%c0_64, %c128_65] : memref<32x560xf32, #tpu.memory_space<vmem>>, vector<32x384xf32>
    %cst_66 = arith.constant dense<0.000000e+00> : vector<1x384xf32>
    %188 = tpu.matmul %186, %187, %cst_66 {dimension_numbers = #tpu.dot_dimension_numbers<[1], [0], [0], [1], [0, 0, 1, 1], [], []>} : vector<1x32xf32>, vector<32x384xf32>, vector<1x384xf32> -> vector<1x384xf32>
    %189 = arith.addf %188, %7 : vector<1x384xf32>
    %190 = vector.extract_strided_slice %189 {offsets = [0, 0], sizes = [1, 128], strides = [1, 1]} : vector<1x384xf32> to vector<1x128xf32>
    %191 = vector.extract_strided_slice %169 {offsets = [0, 0], sizes = [1, 128], strides = [1, 1]} : vector<1x384xf32> to vector<1x128xf32>
    %192 = arith.addf %190, %191 : vector<1x128xf32>
    %193 = arith.negf %192 : vector<1x128xf32>
    %194 = math.exp %193 : vector<1x128xf32>
    %cst_67 = arith.constant 1.000000e+00 : f32
    %195 = vector.broadcast %cst_67 : f32 to vector<1x128xf32>
    %196 = arith.addf %195, %194 : vector<1x128xf32>
    %197 = arith.divf %195, %196 : vector<1x128xf32>
    %198 = vector.extract_strided_slice %189 {offsets = [0, 128], sizes = [1, 128], strides = [1, 1]} : vector<1x384xf32> to vector<1x128xf32>
    %199 = vector.extract_strided_slice %169 {offsets = [0, 128], sizes = [1, 128], strides = [1, 1]} : vector<1x384xf32> to vector<1x128xf32>
    %200 = arith.addf %198, %199 : vector<1x128xf32>
    %201 = arith.negf %200 : vector<1x128xf32>
    %202 = math.exp %201 : vector<1x128xf32>
    %cst_68 = arith.constant 1.000000e+00 : f32
    %203 = vector.broadcast %cst_68 : f32 to vector<1x128xf32>
    %204 = arith.addf %203, %202 : vector<1x128xf32>
    %205 = arith.divf %203, %204 : vector<1x128xf32>
    %206 = vector.extract_strided_slice %189 {offsets = [0, 256], sizes = [1, 128], strides = [1, 1]} : vector<1x384xf32> to vector<1x128xf32>
    %207 = vector.extract_strided_slice %169 {offsets = [0, 256], sizes = [1, 128], strides = [1, 1]} : vector<1x384xf32> to vector<1x128xf32>
    %208 = arith.mulf %197, %207 : vector<1x128xf32>
    %209 = arith.addf %206, %208 : vector<1x128xf32>
    %210 = math.tanh %209 : vector<1x128xf32>
    %211 = vector.extract_strided_slice %205 {offsets = [0, 0], sizes = [1, 32], strides = [1, 1]} : vector<1x128xf32> to vector<1x32xf32>
    %cst_69 = arith.constant 1.000000e+00 : f32
    %212 = vector.broadcast %cst_69 : f32 to vector<1x32xf32>
    %213 = arith.subf %212, %211 : vector<1x32xf32>
    %214 = vector.extract_strided_slice %210 {offsets = [0, 0], sizes = [1, 32], strides = [1, 1]} : vector<1x128xf32> to vector<1x32xf32>
    %215 = arith.mulf %213, %214 : vector<1x32xf32>
    %216 = arith.mulf %211, %165 : vector<1x32xf32>
    %217 = arith.addf %215, %216 : vector<1x32xf32>
    %c0_70 = arith.constant 0 : index
    %c0_71 = arith.constant 0 : index
    %218 = vector.load %arg4[%c0_70, %c0_71] : memref<32x512xf32, #tpu.memory_space<vmem>>, vector<32x512xf32>
    %cst_72 = arith.constant dense<0.000000e+00> : vector<1x512xf32>
    %219 = tpu.matmul %217, %218, %cst_72 {dimension_numbers = #tpu.dot_dimension_numbers<[1], [0], [0], [1], [0, 0, 1, 1], [], []>} : vector<1x32xf32>, vector<32x512xf32>, vector<1x512xf32> -> vector<1x512xf32>
    %220 = vector.extract_strided_slice %219 {offsets = [0, 128], sizes = [1, 384], strides = [1, 1]} : vector<1x512xf32> to vector<1x384xf32>
    %221 = arith.addf %220, %8 : vector<1x384xf32>
    %222 = vector.extract_strided_slice %5 {offsets = [4, 0], sizes = [1, 16], strides = [1, 1]} : vector<6x256xf32> to vector<1x16xf32>
    %223 = vector.extract_strided_slice %219 {offsets = [0, 0], sizes = [1, 16], strides = [1, 1]} : vector<1x512xf32> to vector<1x16xf32>
    %224 = arith.addf %222, %223 : vector<1x16xf32>
    %cst_73 = arith.constant dense<0xFF800000> : vector<1xf32>
    %225 = vector.multi_reduction <maximumf>, %224, %cst_73 [1] : vector<1x16xf32> to vector<1xf32>
    %226 = vector.shape_cast %225 : vector<1xf32> to vector<1x1xf32>
    %227 = vector.broadcast %226 : vector<1x1xf32> to vector<1x16xf32>
    %228 = arith.subf %224, %227 : vector<1x16xf32>
    %229 = math.exp %228 : vector<1x16xf32>
    %cst_74 = arith.constant dense<0.000000e+00> : vector<1xf32>
    %230 = vector.multi_reduction <add>, %229, %cst_74 [1] : vector<1x16xf32> to vector<1xf32>
    %231 = vector.shape_cast %230 : vector<1xf32> to vector<1x1xf32>
    %232 = vector.broadcast %231 : vector<1x1xf32> to vector<1x16xf32>
    %233 = arith.divf %229, %232 : vector<1x16xf32>
    %cst_75 = arith.constant dense<0.000000e+00> : vector<1x32xf32>
    %234 = tpu.matmul %233, %6, %cst_75 {dimension_numbers = #tpu.dot_dimension_numbers<[1], [0], [0], [1], [0, 0, 1, 1], [], []>} : vector<1x16xf32>, vector<16x32xf32>, vector<1x32xf32> -> vector<1x32xf32>
    %235 = vector.extract_strided_slice %5 {offsets = [4, 128], sizes = [1, 32], strides = [1, 1]} : vector<6x256xf32> to vector<1x32xf32>
    %c0_76 = arith.constant 0 : index
    %c0_77 = arith.constant 0 : index
    %236 = vector.load %arg5[%c0_76, %c0_77] : memref<32x560xf32, #tpu.memory_space<vmem>>, vector<32x32xf32>
    %cst_78 = arith.constant dense<0.000000e+00> : vector<1x32xf32>
    %237 = tpu.matmul %234, %236, %cst_78 {dimension_numbers = #tpu.dot_dimension_numbers<[1], [0], [0], [1], [0, 0, 1, 1], [], []>} : vector<1x32xf32>, vector<32x32xf32>, vector<1x32xf32> -> vector<1x32xf32>
    %238 = arith.addf %235, %237 : vector<1x32xf32>
    %c0_79 = arith.constant 0 : index
    %c128_80 = arith.constant 128 : index
    %239 = vector.load %arg5[%c0_79, %c128_80] : memref<32x560xf32, #tpu.memory_space<vmem>>, vector<32x384xf32>
    %cst_81 = arith.constant dense<0.000000e+00> : vector<1x384xf32>
    %240 = tpu.matmul %238, %239, %cst_81 {dimension_numbers = #tpu.dot_dimension_numbers<[1], [0], [0], [1], [0, 0, 1, 1], [], []>} : vector<1x32xf32>, vector<32x384xf32>, vector<1x384xf32> -> vector<1x384xf32>
    %241 = arith.addf %240, %7 : vector<1x384xf32>
    %242 = vector.extract_strided_slice %241 {offsets = [0, 0], sizes = [1, 128], strides = [1, 1]} : vector<1x384xf32> to vector<1x128xf32>
    %243 = vector.extract_strided_slice %221 {offsets = [0, 0], sizes = [1, 128], strides = [1, 1]} : vector<1x384xf32> to vector<1x128xf32>
    %244 = arith.addf %242, %243 : vector<1x128xf32>
    %245 = arith.negf %244 : vector<1x128xf32>
    %246 = math.exp %245 : vector<1x128xf32>
    %cst_82 = arith.constant 1.000000e+00 : f32
    %247 = vector.broadcast %cst_82 : f32 to vector<1x128xf32>
    %248 = arith.addf %247, %246 : vector<1x128xf32>
    %249 = arith.divf %247, %248 : vector<1x128xf32>
    %250 = vector.extract_strided_slice %241 {offsets = [0, 128], sizes = [1, 128], strides = [1, 1]} : vector<1x384xf32> to vector<1x128xf32>
    %251 = vector.extract_strided_slice %221 {offsets = [0, 128], sizes = [1, 128], strides = [1, 1]} : vector<1x384xf32> to vector<1x128xf32>
    %252 = arith.addf %250, %251 : vector<1x128xf32>
    %253 = arith.negf %252 : vector<1x128xf32>
    %254 = math.exp %253 : vector<1x128xf32>
    %cst_83 = arith.constant 1.000000e+00 : f32
    %255 = vector.broadcast %cst_83 : f32 to vector<1x128xf32>
    %256 = arith.addf %255, %254 : vector<1x128xf32>
    %257 = arith.divf %255, %256 : vector<1x128xf32>
    %258 = vector.extract_strided_slice %241 {offsets = [0, 256], sizes = [1, 128], strides = [1, 1]} : vector<1x384xf32> to vector<1x128xf32>
    %259 = vector.extract_strided_slice %221 {offsets = [0, 256], sizes = [1, 128], strides = [1, 1]} : vector<1x384xf32> to vector<1x128xf32>
    %260 = arith.mulf %249, %259 : vector<1x128xf32>
    %261 = arith.addf %258, %260 : vector<1x128xf32>
    %262 = math.tanh %261 : vector<1x128xf32>
    %263 = vector.extract_strided_slice %257 {offsets = [0, 0], sizes = [1, 32], strides = [1, 1]} : vector<1x128xf32> to vector<1x32xf32>
    %cst_84 = arith.constant 1.000000e+00 : f32
    %264 = vector.broadcast %cst_84 : f32 to vector<1x32xf32>
    %265 = arith.subf %264, %263 : vector<1x32xf32>
    %266 = vector.extract_strided_slice %262 {offsets = [0, 0], sizes = [1, 32], strides = [1, 1]} : vector<1x128xf32> to vector<1x32xf32>
    %267 = arith.mulf %265, %266 : vector<1x32xf32>
    %268 = arith.mulf %263, %217 : vector<1x32xf32>
    %269 = arith.addf %267, %268 : vector<1x32xf32>
    %c0_85 = arith.constant 0 : index
    %c0_86 = arith.constant 0 : index
    %270 = vector.load %arg4[%c0_85, %c0_86] : memref<32x512xf32, #tpu.memory_space<vmem>>, vector<32x512xf32>
    %cst_87 = arith.constant dense<0.000000e+00> : vector<1x512xf32>
    %271 = tpu.matmul %269, %270, %cst_87 {dimension_numbers = #tpu.dot_dimension_numbers<[1], [0], [0], [1], [0, 0, 1, 1], [], []>} : vector<1x32xf32>, vector<32x512xf32>, vector<1x512xf32> -> vector<1x512xf32>
    %272 = vector.extract_strided_slice %271 {offsets = [0, 128], sizes = [1, 384], strides = [1, 1]} : vector<1x512xf32> to vector<1x384xf32>
    %273 = arith.addf %272, %8 : vector<1x384xf32>
    %274 = vector.extract_strided_slice %5 {offsets = [5, 0], sizes = [1, 16], strides = [1, 1]} : vector<6x256xf32> to vector<1x16xf32>
    %275 = vector.extract_strided_slice %271 {offsets = [0, 0], sizes = [1, 16], strides = [1, 1]} : vector<1x512xf32> to vector<1x16xf32>
    %276 = arith.addf %274, %275 : vector<1x16xf32>
    %cst_88 = arith.constant dense<0xFF800000> : vector<1xf32>
    %277 = vector.multi_reduction <maximumf>, %276, %cst_88 [1] : vector<1x16xf32> to vector<1xf32>
    %278 = vector.shape_cast %277 : vector<1xf32> to vector<1x1xf32>
    %279 = vector.broadcast %278 : vector<1x1xf32> to vector<1x16xf32>
    %280 = arith.subf %276, %279 : vector<1x16xf32>
    %281 = math.exp %280 : vector<1x16xf32>
    %cst_89 = arith.constant dense<0.000000e+00> : vector<1xf32>
    %282 = vector.multi_reduction <add>, %281, %cst_89 [1] : vector<1x16xf32> to vector<1xf32>
    %283 = vector.shape_cast %282 : vector<1xf32> to vector<1x1xf32>
    %284 = vector.broadcast %283 : vector<1x1xf32> to vector<1x16xf32>
    %285 = arith.divf %281, %284 : vector<1x16xf32>
    %cst_90 = arith.constant dense<0.000000e+00> : vector<1x32xf32>
    %286 = tpu.matmul %285, %6, %cst_90 {dimension_numbers = #tpu.dot_dimension_numbers<[1], [0], [0], [1], [0, 0, 1, 1], [], []>} : vector<1x16xf32>, vector<16x32xf32>, vector<1x32xf32> -> vector<1x32xf32>
    %287 = vector.extract_strided_slice %5 {offsets = [5, 128], sizes = [1, 32], strides = [1, 1]} : vector<6x256xf32> to vector<1x32xf32>
    %c0_91 = arith.constant 0 : index
    %c0_92 = arith.constant 0 : index
    %288 = vector.load %arg5[%c0_91, %c0_92] : memref<32x560xf32, #tpu.memory_space<vmem>>, vector<32x32xf32>
    %cst_93 = arith.constant dense<0.000000e+00> : vector<1x32xf32>
    %289 = tpu.matmul %286, %288, %cst_93 {dimension_numbers = #tpu.dot_dimension_numbers<[1], [0], [0], [1], [0, 0, 1, 1], [], []>} : vector<1x32xf32>, vector<32x32xf32>, vector<1x32xf32> -> vector<1x32xf32>
    %290 = arith.addf %287, %289 : vector<1x32xf32>
    %c0_94 = arith.constant 0 : index
    %c128_95 = arith.constant 128 : index
    %291 = vector.load %arg5[%c0_94, %c128_95] : memref<32x560xf32, #tpu.memory_space<vmem>>, vector<32x384xf32>
    %cst_96 = arith.constant dense<0.000000e+00> : vector<1x384xf32>
    %292 = tpu.matmul %290, %291, %cst_96 {dimension_numbers = #tpu.dot_dimension_numbers<[1], [0], [0], [1], [0, 0, 1, 1], [], []>} : vector<1x32xf32>, vector<32x384xf32>, vector<1x384xf32> -> vector<1x384xf32>
    %293 = arith.addf %292, %7 : vector<1x384xf32>
    %294 = vector.extract_strided_slice %293 {offsets = [0, 0], sizes = [1, 128], strides = [1, 1]} : vector<1x384xf32> to vector<1x128xf32>
    %295 = vector.extract_strided_slice %273 {offsets = [0, 0], sizes = [1, 128], strides = [1, 1]} : vector<1x384xf32> to vector<1x128xf32>
    %296 = arith.addf %294, %295 : vector<1x128xf32>
    %297 = arith.negf %296 : vector<1x128xf32>
    %298 = math.exp %297 : vector<1x128xf32>
    %cst_97 = arith.constant 1.000000e+00 : f32
    %299 = vector.broadcast %cst_97 : f32 to vector<1x128xf32>
    %300 = arith.addf %299, %298 : vector<1x128xf32>
    %301 = arith.divf %299, %300 : vector<1x128xf32>
    %302 = vector.extract_strided_slice %293 {offsets = [0, 128], sizes = [1, 128], strides = [1, 1]} : vector<1x384xf32> to vector<1x128xf32>
    %303 = vector.extract_strided_slice %273 {offsets = [0, 128], sizes = [1, 128], strides = [1, 1]} : vector<1x384xf32> to vector<1x128xf32>
    %304 = arith.addf %302, %303 : vector<1x128xf32>
    %305 = arith.negf %304 : vector<1x128xf32>
    %306 = math.exp %305 : vector<1x128xf32>
    %cst_98 = arith.constant 1.000000e+00 : f32
    %307 = vector.broadcast %cst_98 : f32 to vector<1x128xf32>
    %308 = arith.addf %307, %306 : vector<1x128xf32>
    %309 = arith.divf %307, %308 : vector<1x128xf32>
    %310 = vector.extract_strided_slice %293 {offsets = [0, 256], sizes = [1, 128], strides = [1, 1]} : vector<1x384xf32> to vector<1x128xf32>
    %311 = vector.extract_strided_slice %273 {offsets = [0, 256], sizes = [1, 128], strides = [1, 1]} : vector<1x384xf32> to vector<1x128xf32>
    %312 = arith.mulf %301, %311 : vector<1x128xf32>
    %313 = arith.addf %310, %312 : vector<1x128xf32>
    %314 = math.tanh %313 : vector<1x128xf32>
    %315 = vector.extract_strided_slice %309 {offsets = [0, 0], sizes = [1, 32], strides = [1, 1]} : vector<1x128xf32> to vector<1x32xf32>
    %cst_99 = arith.constant 1.000000e+00 : f32
    %316 = vector.broadcast %cst_99 : f32 to vector<1x32xf32>
    %317 = arith.subf %316, %315 : vector<1x32xf32>
    %318 = vector.extract_strided_slice %314 {offsets = [0, 0], sizes = [1, 32], strides = [1, 1]} : vector<1x128xf32> to vector<1x32xf32>
    %319 = arith.mulf %317, %318 : vector<1x32xf32>
    %320 = arith.mulf %315, %269 : vector<1x32xf32>
    %321 = arith.addf %319, %320 : vector<1x32xf32>
    %322 = tpu.concatenate %25, %77, %129, %181, %233, %285 in 0 : vector<1x16xf32>, vector<1x16xf32>, vector<1x16xf32>, vector<1x16xf32>, vector<1x16xf32>, vector<1x16xf32> -> vector<6x16xf32>
    %c0_100 = arith.constant 0 : index
    %c0_101 = arith.constant 0 : index
    %323 = vector.load %arg7[%c0_100, %c0_101] : memref<6x16xf32, #tpu.memory_space<vmem>>, vector<6x16xf32>
    tpu.vector_store %arg7[%c0_100, %c0_101], %322 {strides = array<i32>} : memref<6x16xf32, #tpu.memory_space<vmem>>, vector<6x16xf32>,
    %c0_102 = arith.constant 0 : index
    %c0_103 = arith.constant 0 : index
    %324 = vector.load %arg9[%c0_102, %c0_103] : memref<1x32xf32, #tpu.memory_space<vmem>>, vector<1x32xf32>
    tpu.vector_store %arg9[%c0_102, %c0_103], %321 {strides = array<i32>} : memref<1x32xf32, #tpu.memory_space<vmem>>, vector<1x32xf32>,
    %c0_104 = arith.constant 0 : index
    %c512 = arith.constant 512 : index
    %325 = vector.load %arg5[%c0_104, %c512] : memref<32x560xf32, #tpu.memory_space<vmem>>, vector<32x48xf32>
    %cst_105 = arith.constant dense<0.000000e+00> : vector<1x48xf32>
    %326 = tpu.matmul %321, %325, %cst_105 {dimension_numbers = #tpu.dot_dimension_numbers<[1], [0], [0], [1], [0, 0, 1, 1], [], []>} : vector<1x32xf32>, vector<32x48xf32>, vector<1x48xf32> -> vector<1x48xf32>
    %c0_106 = arith.constant 0 : index
    %c1024 = arith.constant 1024 : index
    %327 = vector.load %arg6[%c0_106, %c1024] : memref<1x1072xf32, #tpu.memory_space<vmem>>, vector<1x48xf32>
    %328 = arith.addf %326, %327 : vector<1x48xf32>
    %cst_107 = arith.constant dense<0xFF800000> : vector<1xf32>
    %329 = vector.multi_reduction <maximumf>, %328, %cst_107 [1] : vector<1x48xf32> to vector<1xf32>
    %330 = vector.shape_cast %329 : vector<1xf32> to vector<1x1xf32>
    %331 = vector.broadcast %330 : vector<1x1xf32> to vector<1x48xf32>
    %332 = arith.subf %328, %331 : vector<1x48xf32>
    %333 = math.exp %332 : vector<1x48xf32>
    %cst_108 = arith.constant dense<0.000000e+00> : vector<1xf32>
    %334 = vector.multi_reduction <add>, %333, %cst_108 [1] : vector<1x48xf32> to vector<1xf32>
    %335 = vector.shape_cast %334 : vector<1xf32> to vector<1x1xf32>
    %336 = math.log %335 : vector<1x1xf32>
    %337 = vector.broadcast %336 : vector<1x1xf32> to vector<1x48xf32>
    %338 = arith.subf %332, %337 : vector<1x48xf32>
    %c0_109 = arith.constant 0 : index
    %c0_110 = arith.constant 0 : index
    %339 = vector.load %arg8[%c0_109, %c0_110] : memref<1x48xf32, #tpu.memory_space<vmem>>, vector<1x48xf32>
    tpu.vector_store %arg8[%c0_109, %c0_110], %338 {strides = array<i32>} : memref<1x48xf32, #tpu.memory_space<vmem>>, vector<1x48xf32>,
    return
  }
}

</mosaic_0001>

<bundles_post_ra>
// kernel: tpu_custom_call.1
= control target key start
LH: loop header
LB: loop body
LE: loop exit
PB: predicated region body
PF: predicated region fallthrough
CT: control target
= control target key end

     0   :  { %15 = vsyncpa [#allocation3], 0  ;;  %s4563_s0 = inlined_call_operand.hbm [shape: f32[6,32], index: 0, kind: input, shape index: {}]   ;;  %s4564_s1 = inlined_call_operand.vmem [shape: f32[1,32], index: 1, kind: input, shape index: {}]   ;;  %s4565_s2 = inlined_call_operand.hbm [shape: f32[16,32], index: 2, kind: input, shape index: {}]   ;;  %s4566_s3 = inlined_call_operand.hbm [shape: f32[32,256], index: 3, kind: input, shape index: {}]   ;;  %s4567_s4 = inlined_call_operand.hbm [shape: f32[32,512], index: 4, kind: input, shape index: {}]   ;;  %s4568_s5 = inlined_call_operand.hbm [shape: f32[32,560], index: 5, kind: input, shape index: {}]   ;;  %s4569_s6 = inlined_call_operand.vmem [shape: f32[1,1072], index: 6, kind: input, shape index: {}]   ;;  %s4570_s7 = inlined_call_operand.hbm [shape: f32[6,16], index: 7, kind: output, shape index: {0}]   ;;  %s4571_s8 = inlined_call_operand.hbm [shape: f32[1,48], index: 8, kind: output, shape index: {1}]   ;;  %s4572_s9 = inlined_call_operand.hbm [shape: f32[1,32], index: 9, kind: output, shape index: {2}]  }
   0x1   :  { %16 = vsyncpa [#allocation6], 0 }
   0x2   :  { %17 = vsyncpa [#allocation9], 0 }
   0x3   :  { %18 = vsyncpa [#allocation4], 0 }
   0x4   :  { %19 = vsyncpa [#allocation13], 0  ;;  %s3919_s30 = smov [#allocation5]  }
   0x5   :  { %s37_s10 = sshll.u32 %s3919_s30, 4  ;;  %s38_s10 = int_to_ptr.vmem [resolvable:$true] %s37_s10 }
   0x6   :  { %s3757_s11 = scalar_lea.vmem %s38_s10, 256  ;;  %p3762_p1 = scmp.lt.s32.totalorder %s38_s10, %s38_s10 }
   0x7   :  { %p3758_p0 = scmp.ne.s32.totalorder %s38_s10, %s3757_s11  ;;  %p3763_p2 = scmp.lt.s32.totalorder %s3757_s11, %s3757_s11 }
   0x9   :  { %p3764_p3 = por %p3763_p2, %p3762_p1 }
   0xb   :  { %p3765_p4 = pnand %p3764_p3, %p3758_p0 }
   0xd   :  { %3768 = shalt.err (!%p3765_p4)
}
   0xe   :  { %s3920_s12 = smov 128   ;;  %s3921_s13 = smov 8  }
   0xf   :  { %43 = dma.hbm_to_vmem [thread:$0]  %s4565_s2, 256, %s38_s10, [#allocation6], %s3920_s12, %s3920_s12, %s3921_s13  }
  0x10   :  { %s3922_s16 = smov [#allocation8]  }
  0x11   :  { %s61_s17 = sshll.u32 %s3922_s16, 4  ;;  %s62_s17 = int_to_ptr.vmem [resolvable:$true] %s61_s17 }
  0x12   :  { %s3777_s18 = scalar_lea.vmem %s62_s17, 2048  ;;  %p3782_p6 = scmp.lt.s32.totalorder %s62_s17, %s62_s17 }
  0x13   :  { %p3778_p5 = scmp.ne.s32.totalorder %s62_s17, %s3777_s18  ;;  %p3783_p7 = scmp.lt.s32.totalorder %s3777_s18, %s3777_s18 }
  0x15   :  { %p3784_p8 = por %p3783_p7, %p3782_p6 }
  0x17   :  { %p3785_p9 = pnand %p3784_p8, %p3778_p5 }
  0x19   :  { %3788 = shalt.err (!%p3785_p9)
}
  0x1a   :  { %s3923_s19 = smov 512   ;;  %s3924_s20 = smov 32  }
  0x1b   :  { %67 = dma.hbm_to_vmem [thread:$0]  %s4567_s4, 2048, %s62_s17, [#allocation9], %s3923_s19, %s3923_s19, %s3924_s20  }
  0x1c   :  { %s3925_s23 = smov [#allocation2]   ;;  %s3926_s25 = smov [#allocation7]  }
  0x1d   :  { %s26_s24 = sshll.u32 %s3925_s23, 4  ;;  %s49_s2 = sshll.u32 %s3926_s25, 4  ;;  %s27_s24 = int_to_ptr.vmem [resolvable:$true] %s26_s24  ;;  %s50_s2 = int_to_ptr.vmem [resolvable:$true] %s49_s2 }
  0x1e   :  { %s3797_s26 = scalar_lea.vmem %s27_s24, 128  ;;  %p3802_p11 = scmp.lt.s32.totalorder %s27_s24, %s27_s24 }
  0x1f   :  { %p3798_p10 = scmp.ne.s32.totalorder %s27_s24, %s3797_s26  ;;  %p3803_p12 = scmp.lt.s32.totalorder %s3797_s26, %s3797_s26 }
  0x21   :  { %p3804_p13 = por %p3803_p12, %p3802_p11 }
  0x23   :  { %p3805_p0 = pnand %p3804_p13, %p3798_p10 }
  0x25   :  { %3808 = shalt.err (!%p3805_p0)
}
  0x26   :  { %29 = dma.hbm_to_vmem [thread:$0]  %s4563_s0, 128, %s27_s24, [#allocation3]  }
  0x27   :  { %s3817_s29 = scalar_lea.vmem %s50_s2, 1024  ;;  %p3822_p2 = scmp.lt.s32.totalorder %s50_s2, %s50_s2 }
  0x28   :  { %p3818_p1 = scmp.ne.s32.totalorder %s50_s2, %s3817_s29  ;;  %p3823_p3 = scmp.lt.s32.totalorder %s3817_s29, %s3817_s29 }
  0x2a   :  { %p3824_p4 = por %p3823_p3, %p3822_p2 }
  0x2c   :  { %p3825_p5 = pnand %p3824_p4, %p3818_p1 }
  0x2e   :  { %3828 = shalt.err (!%p3825_p5)
}
  0x2f   :  { %s3927_s4 = smov 256   ;;  %s3928_s30 = smov 16  }
  0x30   :  { %55 = dma.hbm_to_vmem [thread:$0]  %s4566_s3, 1024, %s50_s2, [#allocation6], %s3927_s4, %s3927_s4, %s3928_s30  }
  0x31   :  { %s3929_s12 = smov [#allocation10]  }
  0x32   :  { %s73_s13 = sshll.u32 %s3929_s12, 4  ;;  %s74_s13 = int_to_ptr.vmem [resolvable:$true] %s73_s13 }
  0x33   :  { %s3837_s14 = scalar_lea.vmem %s74_s13, 2560  ;;  %p3842_p7 = scmp.lt.s32.totalorder %s74_s13, %s74_s13 }
  0x34   :  { %p3838_p6 = scmp.ne.s32.totalorder %s74_s13, %s3837_s14  ;;  %p3843_p8 = scmp.lt.s32.totalorder %s3837_s14, %s3837_s14 }
  0x36   :  { %p3844_p9 = por %p3843_p8, %p3842_p7 }
  0x38   :  { %p3845_p10 = pnand %p3844_p9, %p3838_p6 }
  0x3a   :  { %3848 = shalt.err (!%p3845_p10)
}
  0x3b   :  { %s3930_s0 = smov 640   ;;  %s3931_s15 = smov 40  }
  0x3c   :  { %79 = dma.hbm_to_vmem [thread:$0]  %s4568_s5, 2560, %s74_s13, [#allocation9], %s3930_s0, %s3930_s0, %s3931_s15  }
  0x3d   :  { %3909 = dma.done.wait [#allocation3], 128  }
  0x3e   :  { %3910 = vsyncadd [#allocation3], 4294967168 }
  0x3f   :  { %3911 = dma.done.wait [#allocation6], 1280  }
  0x40   :  { %3912 = vsyncadd [#allocation6], 4294966016 }
  0x41   :  { %3913 = dma.done.wait [#allocation9], 4608  }
  0x42   :  { %3914 = vsyncadd [#allocation9], 4294962688  ;;  %v4573_v0 = vmov 0.0   ;;  %v105_v1 = vld [vmem:[#allocation7 + $0x38] sm:$0xff]  ;;  %v4004_v2 = vld [vmem:[#allocation8 + $0x68] sm:$0xff]  ;;  %vm118_vm0 = vcmask 261120   ;;  %v108_v19 = vlaneseq }
  0x43   :  { %186 = vmatprep.mubr.f32.mxu0 %v4573_v0  ;;  %281 = vmatprep.mubr.f32.mxu1 %v4573_v0  ;;  %v104_v3 = vld [vmem:[#allocation7 + $0x30] sm:$0xff]  ;;  %v4007_v4 = vld [vmem:[#allocation8 + $0x60] sm:$0xff]  ;;  %v103_v5 = vld [vmem:[#allocation7 + $0x28] sm:$0xff]  ;;  %vm379_vm1 = vcmask 122880   ;;  %vm3933_vm2 = vmmov 0   ;;  %vm391_vm3 = vcmask 130048  }
  0x44   :  { %146 = vmatprep.subr.mxu0 %v105_v1  ;;  %241 = vmatprep.subr.mxu1 %v4004_v2  ;;  %v4009_v6 = vld [vmem:[#allocation8 + $0x48] sm:$0xff]  ;;  %v102_v7 = vld [vmem:[#allocation7 + $0x20] sm:$0xff]  ;;  %v101_v9 = vld [vmem:[#allocation7 + $0x18] sm:$0xff]  ;;  %v4038_v20 = vshrl.u32 %v108_v19, 7  ;;  %vm888_vm4 = vcmask 123905   ;;  %vm1369_vm5 = vcmask 124930  }
  0x45   :  { %147 = vmatpush1.msra.mxu0 %v104_v3  ;;  %242 = vmatpush1.msra.mxu1 %v4007_v4  ;;  %v4012_v8 = vld [vmem:[#allocation8 + $0x40] sm:$0xff]  ;;  %v4015_v10 = vld [vmem:[#allocation8 + $0x28] sm:$0xff]  ;;  %v100_v11 = vld [vmem:[#allocation7 + $0x10] sm:$0xff]  ;;  %vm3141_vm6 = vcmask 1040384   ;;  %vm3143_vm7 = vcmask 1041408   ;;  %vm1850_vm8 = vcmask 125955  }
  0x46   :  { %148 = vmatprep.subr.mxu0 %v103_v5  ;;  %243 = vmatprep.subr.mxu1 %v4009_v6  ;;  %v4017_v12 = vld [vmem:[#allocation8 + $0x20] sm:$0xff]  ;;  %v99_v13 = vld [vmem:[#allocation7 + $0x8] sm:$0xff]  ;;  %v4041_v21 = vsub.s32 0, %v4038_v20  ;;  %v4053_v34 = vld [vmem:[#allocation5 + $0x8] sm:$0xff]  ;;  %v114_v5 = vsub.s32 1, %v4038_v20  ;;  %vm3145_vm9 = vcmask 1042432  }
  0x47   :  { %149 = vmatpush1.msra.mxu0 %v102_v7  ;;  %244 = vmatpush1.msra.mxu1 %v4012_v8  ;;  %v4020_v14 = vld [vmem:[#allocation8 + $0x8] sm:$0xff]  ;;  %v98_v15 = vld [vmem:[#allocation7] sm:$0xff]  ;;  %v4055_v35 = vld [vmem:[#allocation5] sm:$0xff]  ;;  %vm2331_vm10 = vcmask 126980   ;;  %vm3147_vm11 = vcmask 1043456   ;;  %vm2812_vm12 = vcmask 128005  }
  0x48   :  { %150 = vmatprep.subr.mxu0 %v101_v9  ;;  %245 = vmatprep.subr.mxu1 %v4015_v10  ;;  %v4023_v16 = vld [vmem:[#allocation8] sm:$0xff]  ;;  %v97_v17 = vld [vmem:[#allocation2] sm:$0x3f]  ;;  %v4065_v39 = vld [vmem:[#allocation10 + $0x78] sm:$0xff]  ;;  %vm3149_vm13 = vcmask 1044480   ;;  %vm3151_vm14 = vcmask 128000  }
  0x49   :  { %151 = vmatpush1.msra.mxu0 %v100_v11  ;;  %246 = vmatpush1.msra.mxu1 %v4017_v12  ;;  %v4029_v18 = vld [vmem:[%s4564_s1] sm:$0x1]  ;;  %v4069_v40 = vld [vmem:[#allocation10 + $0x50] sm:$0xff]  ;;  %v4081_v42 = vld [vmem:[#allocation10] sm:$0xff]  ;;  %vm3153_vm15 = vcmask 253952   ;;  %s3934_s25 = smov [#allocation11]  }
  0x4a   :  { %152 = vmatprep.subr.mxu0 %v99_v13  ;;  %247 = vmatprep.subr.mxu1 %v4020_v14  ;;  %v4046_v22 = vld [vmem:[%s4569_s6] sm:$0x3]  ;;  %v4085_v43 = vld [vmem:[#allocation8 + $0x78] sm:$0xff]  ;;  %v4087_v44 = vld [vmem:[#allocation8 + $0x70] sm:$0xff]  ;;  %s3253_s2 = sshll.u32 %s3934_s25, 4  ;;  %s3254_s2 = int_to_ptr.vmem [resolvable:$true] %s3253_s2 }
  0x4b   :  { %153 = vmatpush1.msra.mxu0 %v98_v15  ;;  %248 = vmatpush1.msra.mxu1 %v4023_v16  ;;  %v111_v23 = vrot.slane %v4046_v22, %v4041_v21  ;;  %v4075_v41 = vld [vmem:[#allocation10 + $0x28] sm:$0xff]  ;;  %v4089_v45 = vld [vmem:[#allocation8 + $0x58] sm:$0xff]  ;;  %v4092_v46 = vld [vmem:[#allocation8 + $0x50] sm:$0xff]  ;;  %v115_v7 = vrot.slane %v4046_v22, %v114_v5  ;;  %s3849_s26 = scalar_lea.vmem %s3254_s2, 128  ;;  %p3854_p12 = scmp.lt.s32.totalorder %s3254_s2, %s3254_s2 }
  0x4c   :  { %3291 = vmatmul.mubr.msk.f32.vlgmr.msra.gmra.mxu0 %vm118_vm0, %v97_v17  ;;  %3292 = vmatmul.mubr.msk.f32.vlgmr.msra.gmra.mxu1 %vm118_vm0, %v4029_v18  ;;  %v4095_v47 = vld [vmem:[#allocation8 + $0x38] sm:$0xff]  ;;  %v4098_v48 = vld [vmem:[#allocation8 + $0x30] sm:$0xff]  ;;  %v4107_v51 = vld [vmem:[#allocation10 + $0x88] sm:$0xff]  ;;  %p3850_p11 = scmp.ne.s32.totalorder %s3254_s2, %s3849_s26  ;;  %p3855_p13 = scmp.lt.s32.totalorder %s3849_s26, %s3849_s26 }
  0x4d   :  { %3424 = vmatprep.subr.mxu1 %v4573_v0  ;;  %352 = vmatprep.mubr.f32.mxu0 %v4573_v0  ;;  %v4101_v49 = vld [vmem:[#allocation8 + $0x18] sm:$0xff]  ;;  %v4104_v50 = vld [vmem:[#allocation8 + $0x10] sm:$0xff]  ;;  %4577 = vst [vmem:[#allocation20_spill] sm:$0xff] %v4107_v51  ;;  %v4110_v52 = vld [vmem:[#allocation10 + $0x80] sm:$0xff] }
  0x4e   :  { %3425 = vmatpush3.msra.mxu1 %v4053_v34  ;;  %3428 = vmatprep.mubr.msk.f32.mxu1 %vm3933_vm2, %v4573_v0  ;;  %v4113_v53 = vld [vmem:[#allocation10 + $0x60] sm:$0xff]  ;;  %v4118_v54 = vld [vmem:[#allocation10 + $0x58] sm:$0xff]  ;;  %v4127_v57 = vld [vmem:[#allocation10 + $0x90] sm:$0xff]  ;;  %p3856_p0 = por %p3855_p13, %p3854_p12 }
  0x4f   :  { %3426 = vmatprep.subr.mxu1 %v4573_v0  ;;  %312 = vmatprep.subr.mxu0 %v4085_v43  ;;  %v4121_v55 = vld [vmem:[#allocation10 + $0x38] sm:$0xff]  ;;  %v4130_v59 = vld [vmem:[#allocation10 + $0x68] sm:$0xff]  ;;  %v4138_v61 = vld [vmem:[#allocation10 + $0x30] sm:$0xff] }
  0x50   :  { %3427 = vmatpush3.msra.mxu1 %v4055_v35  ;;  %313 = vmatpush1.msra.mxu0 %v4087_v44  ;;  %v4140_v62 = vld [vmem:[#allocation10 + $0x40] sm:$0xff]  ;;  %v4144_v63 = vld [vmem:[#allocation10 + $0x10] sm:$0xff]  ;;  %v4148_v1 = vld [vmem:[#allocation10 + $0x8] sm:$0xff]  ;;  %p3857_p1 = pnand %p3856_p0, %p3850_p11 }
  0x51   :  { %3431 = vmatprep.subr.mxu1 %v4573_v0  ;;  %314 = vmatprep.subr.mxu0 %v4089_v45  ;;  %v4150_v3 = vld [vmem:[#allocation10 + $0x18] sm:$0xff]  ;;  %v195_v19 = vld [vmem:[%s4569_s6 + $0x2] sm:$0x7]  ;;  %v196_v22 = vld [vmem:[%s4569_s6 + $0x5] sm:$0x7] }
  0x52   :  { %315 = vmatpush1.msra.mxu0 %v4092_v46 }
  0x53   :  { %316 = vmatprep.subr.mxu0 %v4095_v47 }
  0x54   :  { %317 = vmatpush1.msra.mxu0 %v4098_v48 }
  0x55   :  { %318 = vmatprep.subr.mxu0 %v4101_v49 }
  0x56   :  { %319 = vmatpush1.msra.mxu0 %v4104_v50 }
  0x57   :  { %3293 = vmatmul.mubr.msk.f32.vlgmr.msra.gmra.mxu0 %vm118_vm0, %v4029_v18  ;;  %598 = vmatprep.subr.mxu0 %v4107_v51 }
  0x58   :  { %599 = vmatpush1.msra.mxu0 %v4110_v52  ;;  %638 = vmatprep.mubr.f32.mxu0 %v4573_v0 }
  0x59   :  { %600 = vmatprep.subr.mxu0 %v4113_v53 }
  0x5a   :  { %601 = vmatpush1.msra.mxu0 %v4118_v54 }
  0x5b   :  { %602 = vmatprep.subr.mxu0 %v4121_v55 }
  0x5c   :  { %603 = vmatpush1.msra.mxu0 %v4138_v61 }
  0x5d   :  { %604 = vmatprep.subr.mxu0 %v4144_v63 }
  0x5e   :  { %605 = vmatpush1.msra.mxu0 %v4148_v1 }
  0x5f   :  { %763 = vmatprep.subr.mxu0 %v4004_v2 }
 0x10c   :  { %v188_v24 = vpop.f32.mrf.mxu0  ;;  %v283_v26 = vpop.f32.mrf.mxu1 }
 0x10d   :  { %v4050_v25 = vadd.f32 %v188_v24, %v111_v23  ;;  %v4188_v24 = vrot.slane %v196_v22, %v4041_v21 }
 0x10e   :  { %v285_v56 = vpop.f32.mrf.mxu1  ;;  %v190_v9 = vpop.f32.mrf.mxu0 }
 0x10f   :  { %v378_v27 = vadd.f32 %v283_v26, %v4050_v25  ;;  %v4158_v11 = vadd.f32 %v190_v9, %v115_v7  ;;  %v4191_v26 = vrot.slane %v195_v19, %v4041_v21 }
 0x111   :  { %v380_v28 = vsel %vm379_vm1, %v378_v27, -inf }
 0x112   :  { %381 = vmax.xlane.f32.xlu0 %v380_v28 }
 0x117   :  { %v354_v23 = vpop.f32.mrf.mxu0 }
 0x19b   :  { %v382_v29 = vpop.xlane.xlu0 %381 }
 0x19c   :  { %v383_v30 = vsub.f32 %v378_v27, %v382_v29  ;;  %v356_v27 = vpop.f32.mrf.mxu0 }
 0x19e   :  { %v384_v31 = vmul.f32 1.442695, %v383_v30  ;;  %v4193_v30 = vrot.slane %v195_v19, %v114_v5 }
 0x1a0   :  { %3627 = vpow2.f32 %v384_v31  ;;  %v375_v31 = vadd.f32 %v4188_v24, %v285_v56  ;;  %v370_v56 = vsub.s32 2, %v4038_v20 }
 0x1ad   :  { %v3628_v32 = vpop.eup %3627 }
 0x1ae   :  { %v386_v33 = vsel %vm379_vm1, %v3628_v32, 0.0  ;;  %vm3233_vm1 = vcmask 385024  }
 0x1af   :  { %387 = vadd.xlane.f32.xlu0 %v386_v33 }
 0x238   :  { %v388_v36 = vpop.xlane.xlu0 %387 }
 0x239   :  { %3629 = vrcp.f32 %v388_v36 }
 0x246   :  { %v3630_v37 = vpop.eup %3629 }
 0x247   :  { %v4063_v38 = vmul.f32 %v3630_v37, %v3628_v32  ;;  %v4197_v37 = vrot.slane %v196_v22, %v114_v5  ;;  %v4204_v5 = vrot.slane %v195_v19, %v370_v56  ;;  %v4578_v19 = vmov 0.0  }
 0x249   :  { %3429 = vmatmul.mubr.msk.f32.vlgmr.msra.gmra.mxu1 %vm391_vm3, %v4063_v38  ;;  %v376_v21 = vadd.f32 %v4197_v37, %v354_v23 }
 0x24a   :  { %3432 = vmatpush3.msra.mxu1 %v4065_v39  ;;  %3439 = vmatprep.mubr.msk.f32.mxu1 %vm3933_vm2, %v4573_v0 }
 0x24b   :  { %3433 = vmatprep.subr.mxu1 %v4573_v0 }
 0x24c   :  { %3434 = vmatpush3.msra.mxu1 %v4069_v40 }
 0x24d   :  { %3435 = vmatprep.subr.mxu1 %v4573_v0 }
 0x24e   :  { %3436 = vmatpush3.msra.mxu1 %v4075_v41 }
 0x24f   :  { %3437 = vmatprep.subr.mxu1 %v4573_v0 }
 0x250   :  { %3438 = vmatpush3.msra.mxu1 %v4081_v42 }
 0x251   :  { %3442 = vmatprep.subr.mxu1 %v4573_v0 }
 0x309   :  { %v461_v58 = vpop.f32.mrf.mxu1 }
 0x30a   :  { %3440 = vmatmul.mubr.msk.f32.vlgmr.msra.gmra.mxu1 %vm118_vm0, %v461_v58 }
 0x30b   :  { %v3430_v60 = vpop.f32.mrf.mxu1  ;;  %3443 = vmatpush3.msra.mxu1 %v4127_v57  ;;  %3450 = vmatprep.mubr.msk.f32.mxu1 %vm3933_vm2, %v4573_v0 }
 0x30c   :  { %3444 = vmatprep.subr.mxu1 %v4573_v0 }
 0x30d   :  { %3445 = vmatpush3.msra.mxu1 %v4130_v59 }
 0x30e   :  { %3446 = vmatprep.subr.mxu1 %v4573_v0 }
 0x30f   :  { %3447 = vmatpush3.msra.mxu1 %v4140_v62 }
 0x310   :  { %3448 = vmatprep.subr.mxu1 %v4573_v0 }
 0x311   :  { %3449 = vmatpush3.msra.mxu1 %v4150_v3 }
 0x312   :  { %834 = vmatprep.subr.mxu1 %v4085_v43 }
 0x3ca   :  { %v538_v13 = vpop.f32.mrf.mxu1 }
 0x3cb   :  { %v542_v15 = vadd.f32 %v538_v13, %v4158_v11 }
 0x3cc   :  { %v3441_v17 = vpop.f32.mrf.mxu1 }
 0x3cd   :  { %3296 = vmatmul.mubr.msk.f32.vlgmr.msra.gmra.mxu0 %vm118_vm0, %v542_v15  ;;  %3451 = vmatmul.mubr.msk.f32.vlgmr.msra.gmra.mxu1 %vm118_vm0, %v542_v15 }
 0x3ce   :  { %764 = vmatpush1.msra.mxu0 %v4007_v4  ;;  %835 = vmatpush1.msra.mxu1 %v4087_v44 }
 0x3cf   :  { %765 = vmatprep.subr.mxu0 %v4009_v6  ;;  %836 = vmatprep.subr.mxu1 %v4089_v45 }
 0x3d0   :  { %766 = vmatpush1.msra.mxu0 %v4012_v8  ;;  %837 = vmatpush1.msra.mxu1 %v4092_v46 }
 0x3d1   :  { %767 = vmatprep.subr.mxu0 %v4015_v10  ;;  %838 = vmatprep.subr.mxu1 %v4095_v47 }
 0x3d2   :  { %768 = vmatpush1.msra.mxu0 %v4017_v12  ;;  %839 = vmatpush1.msra.mxu1 %v4098_v48 }
 0x3d3   :  { %769 = vmatprep.subr.mxu0 %v4020_v14  ;;  %840 = vmatprep.subr.mxu1 %v4101_v49 }
 0x3d4   :  { %770 = vmatpush1.msra.mxu0 %v4023_v16  ;;  %803 = vmatprep.mubr.f32.mxu0 %v4573_v0 }
 0x3d5   :  { %841 = vmatpush1.msra.mxu1 %v4104_v50  ;;  %874 = vmatprep.mubr.f32.mxu1 %v4573_v0 }
 0x3d6   :  { %3453 = vmatprep.subr.mxu0 %v4573_v0  ;;  %1079 = vmatprep.subr.mxu1 %v4107_v51  ;;  %v4202_v0 = vrot.slane %v196_v22, %v370_v56 }
 0x48d   :  { %v640_v28 = vpop.f32.mrf.mxu0  ;;  %v711_v29 = vpop.f32.mrf.mxu1 }
 0x48e   :  { %v641_v32 = vadd.f32 %v640_v28, %v4191_v26  ;;  %v712_v23 = vadd.f32 %v711_v29, %v4204_v5 }
 0x48f   :  { %v642_v33 = vpop.f32.mrf.mxu0  ;;  %v3452_v36 = vpop.f32.mrf.mxu1 }
 0x490   :  { %v715_v58 = vadd.f32 %v641_v32, %v375_v31  ;;  %v643_v7 = vadd.f32 %v642_v33, %v4193_v30  ;;  %v377_v32 = vadd.f32 %v4202_v0, %v356_v27 }
 0x492   :  { %v3298_v60 = vmul.f32 -1.442695, %v715_v58  ;;  %v722_v9 = vadd.f32 %v643_v7, %v376_v21 }
 0x494   :  { %3631 = vpow2.f32 %v3298_v60  ;;  %v3299_v13 = vmul.f32 -1.442695, %v722_v9 }
 0x496   :  { %3633 = vpow2.f32 %v3299_v13 }
 0x4a1   :  { %v3632_v15 = vpop.eup %3631 }
 0x4a2   :  { %v719_v17 = vadd.f32 1.0, %v3632_v15 }
 0x4a3   :  { %v3634_v28 = vpop.eup %3633 }
 0x4a4   :  { %3635 = vrcp.f32 %v719_v17  ;;  %v726_v31 = vadd.f32 1.0, %v3634_v28 }
 0x4a6   :  { %3637 = vrcp.f32 %v726_v31 }
 0x4b1   :  { %v3636_v33 = vpop.eup %3635 }
 0x4b2   :  { %v729_v36 = vmul.f32 %v3636_v33, %v377_v32 }
 0x4b3   :  { %v3638_v60 = vpop.eup %3637 }
 0x4b4   :  { %v730_v58 = vadd.f32 %v729_v36, %v712_v23  ;;  %v732_v7 = vsub.f32 1.0, %v3638_v60  ;;  %v734_v20 = vmul.f32 %v3638_v60, %v4029_v18 }
 0x4b6   :  { %3639 = vtanh.f32 %v730_v58 }
 0x4c3   :  { %v3640_v21 = vpop.eup %3639 }
 0x4c4   :  { %v733_v9 = vmul.f32 %v3640_v21, %v732_v7 }
 0x4c6   :  { %v4209_v22 = vadd.f32 %v734_v20, %v733_v9 }
 0x4c8   :  { %3300 = vmatmul.mubr.msk.f32.vlgmr.msra.gmra.mxu0 %vm118_vm0, %v4209_v22  ;;  %3301 = vmatmul.mubr.msk.f32.vlgmr.msra.gmra.mxu1 %vm118_vm0, %v4209_v22 }
 0x4c9   :  { %3454 = vmatpush3.msra.mxu0 %v4053_v34  ;;  %3457 = vmatprep.mubr.msk.f32.mxu0 %vm3933_vm2, %v4578_v19 }
 0x4ca   :  { %3455 = vmatprep.subr.mxu0 %v4578_v19  ;;  %1080 = vmatpush1.msra.mxu1 %v4110_v52 }
 0x4cb   :  { %3456 = vmatpush3.msra.mxu0 %v4055_v35  ;;  %1081 = vmatprep.subr.mxu1 %v4113_v53 }
 0x4cc   :  { %3460 = vmatprep.subr.mxu0 %v4578_v19  ;;  %1082 = vmatpush1.msra.mxu1 %v4118_v54 }
 0x4cd   :  { %1083 = vmatprep.subr.mxu1 %v4121_v55  ;;  %1119 = vmatprep.mubr.f32.mxu1 %v4578_v19 }
 0x4ce   :  { %1084 = vmatpush1.msra.mxu1 %v4138_v61 }
 0x4cf   :  { %1085 = vmatprep.subr.mxu1 %v4144_v63 }
 0x4d0   :  { %1086 = vmatpush1.msra.mxu1 %v4148_v1 }
 0x4d1   :  { %1244 = vmatprep.subr.mxu1 %v4004_v2 }
 0x588   :  { %v805_v18 = vpop.f32.mrf.mxu0 }
 0x589   :  { %v885_v27 = vrot.slane %v805_v18, 7 }
 0x58a   :  { %v807_v58 = vpop.f32.mrf.mxu0 }
 0x58b   :  { %v887_v29 = vadd.f32 %v885_v27, %v4050_v25 }
 0x58d   :  { %v889_v13 = vsel %vm888_vm4, %v887_v29, -inf }
 0x58e   :  { %890 = vmax.xlane.f32.xlu1 %v889_v13 }
 0x617   :  { %v891_v15 = vpop.xlane.xlu1 %890 }
 0x618   :  { %v892_v17 = vsub.f32 %v887_v29, %v891_v15  ;;  %v876_v29 = vpop.f32.mrf.mxu1 }
 0x61a   :  { %v893_v56 = vmul.f32 1.442695, %v892_v17  ;;  %v878_v13 = vpop.f32.mrf.mxu1 }
 0x61c   :  { %3641 = vpow2.f32 %v893_v56  ;;  %v881_v56 = vadd.f32 %v807_v58, %v4188_v24  ;;  %v883_v58 = vadd.f32 %v878_v13, %v4202_v0 }
 0x629   :  { %v3642_v28 = vpop.eup %3641 }
 0x62a   :  { %v895_v31 = vsel %vm888_vm4, %v3642_v28, 0.0 }
 0x62b   :  { %896 = vadd.xlane.f32.xlu1 %v895_v31 }
 0x6b4   :  { %v897_v32 = vpop.xlane.xlu1 %896 }
 0x6b5   :  { %3643 = vrcp.f32 %v897_v32 }
 0x6c2   :  { %v3644_v33 = vpop.eup %3643 }
 0x6c3   :  { %v4231_v23 = vmul.f32 %v3644_v33, %v3642_v28 }
 0x6c5   :  { %v901_v36 = vrot.slane %v4231_v23, 1 }
 0x6c7   :  { %3458 = vmatmul.mubr.msk.f32.vlgmr.msra.gmra.mxu0 %vm391_vm3, %v901_v36 }
 0x6c8   :  { %3461 = vmatpush3.msra.mxu0 %v4065_v39  ;;  %3468 = vmatprep.mubr.msk.f32.mxu0 %vm3933_vm2, %v4578_v19 }
 0x6c9   :  { %3462 = vmatprep.subr.mxu0 %v4578_v19 }
 0x6ca   :  { %3463 = vmatpush3.msra.mxu0 %v4069_v40 }
 0x6cb   :  { %3464 = vmatprep.subr.mxu0 %v4578_v19 }
 0x6cc   :  { %3465 = vmatpush3.msra.mxu0 %v4075_v41 }
 0x6cd   :  { %3466 = vmatprep.subr.mxu0 %v4578_v19 }
 0x6ce   :  { %3467 = vmatpush3.msra.mxu0 %v4081_v42 }
 0x6cf   :  { %3471 = vmatprep.subr.mxu0 %v4578_v19 }
 0x787   :  { %v970_v60 = vpop.f32.mrf.mxu0 }
 0x788   :  { %3469 = vmatmul.mubr.msk.f32.vlgmr.msra.gmra.mxu0 %vm118_vm0, %v970_v60 }
 0x789   :  { %v3459_v7 = vpop.f32.mrf.mxu0  ;;  %3472 = vmatpush3.msra.mxu0 %v4127_v57  ;;  %3479 = vmatprep.mubr.msk.f32.mxu0 %vm3933_vm2, %v4578_v19 }
 0x78a   :  { %3473 = vmatprep.subr.mxu0 %v4578_v19  ;;  %v882_v7 = vadd.f32 %v876_v29, %v4197_v37 }
 0x78b   :  { %3474 = vmatpush3.msra.mxu0 %v4130_v59 }
 0x78c   :  { %3475 = vmatprep.subr.mxu0 %v4578_v19 }
 0x78d   :  { %3476 = vmatpush3.msra.mxu0 %v4140_v62 }
 0x78e   :  { %3477 = vmatprep.subr.mxu0 %v4578_v19 }
 0x78f   :  { %3478 = vmatpush3.msra.mxu0 %v4150_v3 }
 0x790   :  { %1315 = vmatprep.subr.mxu0 %v4085_v43 }
 0x848   :  { %v1043_v21 = vpop.f32.mrf.mxu0 }
 0x849   :  { %v1048_v9 = vrot.slane %v1043_v21, 7 }
 0x84a   :  { %v3470_v20 = vpop.f32.mrf.mxu0 }
 0x84b   :  { %v1050_v18 = vadd.f32 %v1048_v9, %v4158_v11 }
 0x84d   :  { %v1052_v27 = vrot.slane %v1050_v18, 1 }
 0x84f   :  { %3304 = vmatmul.mubr.msk.f32.vlgmr.msra.gmra.mxu1 %vm118_vm0, %v1052_v27  ;;  %3480 = vmatmul.mubr.msk.f32.vlgmr.msra.gmra.mxu0 %vm118_vm0, %v1052_v27 }
 0x850   :  { %1245 = vmatpush1.msra.mxu1 %v4007_v4  ;;  %1316 = vmatpush1.msra.mxu0 %v4087_v44 }
 0x851   :  { %1246 = vmatprep.subr.mxu1 %v4009_v6  ;;  %1317 = vmatprep.subr.mxu0 %v4089_v45 }
 0x852   :  { %1247 = vmatpush1.msra.mxu1 %v4012_v8  ;;  %1318 = vmatpush1.msra.mxu0 %v4092_v46 }
 0x853   :  { %1248 = vmatprep.subr.mxu1 %v4015_v10  ;;  %1319 = vmatprep.subr.mxu0 %v4095_v47 }
 0x854   :  { %1249 = vmatpush1.msra.mxu1 %v4017_v12  ;;  %1320 = vmatpush1.msra.mxu0 %v4098_v48 }
 0x855   :  { %1250 = vmatprep.subr.mxu1 %v4020_v14  ;;  %1321 = vmatprep.subr.mxu0 %v4101_v49 }
 0x856   :  { %1251 = vmatpush1.msra.mxu1 %v4023_v16  ;;  %1284 = vmatprep.mubr.f32.mxu1 %v4578_v19 }
 0x857   :  { %1322 = vmatpush1.msra.mxu0 %v4104_v50  ;;  %1355 = vmatprep.mubr.f32.mxu0 %v4578_v19 }
 0x858   :  { %3482 = vmatprep.subr.mxu1 %v4578_v19  ;;  %1560 = vmatprep.subr.mxu0 %v4107_v51 }
 0x90f   :  { %v1121_v15 = vpop.f32.mrf.mxu1  ;;  %v1192_v17 = vpop.f32.mrf.mxu0 }
 0x910   :  { %v1122_v28 = vadd.f32 %v1121_v15, %v4191_v26 }
 0x911   :  { %v1123_v31 = vpop.f32.mrf.mxu1  ;;  %v3481_v32 = vpop.f32.mrf.mxu0 }
 0x912   :  { %v1196_v33 = vadd.f32 %v1122_v28, %v881_v56  ;;  %v1124_v60 = vadd.f32 %v1123_v31, %v4193_v30  ;;  %v1193_v32 = vadd.f32 %v1192_v17, %v4204_v5 }
 0x914   :  { %v3306_v36 = vmul.f32 -1.442695, %v1196_v33  ;;  %v1203_v21 = vadd.f32 %v1124_v60, %v882_v7 }
 0x916   :  { %3645 = vpow2.f32 %v3306_v36  ;;  %v3307_v9 = vmul.f32 -1.442695, %v1203_v21 }
 0x918   :  { %3647 = vpow2.f32 %v3307_v9 }
 0x923   :  { %v3646_v20 = vpop.eup %3645 }
 0x924   :  { %v1200_v18 = vadd.f32 1.0, %v3646_v20 }
 0x925   :  { %v3648_v27 = vpop.eup %3647 }
 0x926   :  { %3649 = vrcp.f32 %v1200_v18  ;;  %v1207_v51 = vadd.f32 1.0, %v3648_v27 }
 0x928   :  { %3651 = vrcp.f32 %v1207_v51 }
 0x933   :  { %v3650_v15 = vpop.eup %3649 }
 0x934   :  { %v1210_v56 = vmul.f32 %v3650_v15, %v883_v58 }
 0x935   :  { %v3652_v31 = vpop.eup %3651 }
 0x936   :  { %v1211_v28 = vadd.f32 %v1210_v56, %v1193_v32  ;;  %v1213_v29 = vsub.f32 1.0, %v3652_v31  ;;  %v1215_v60 = vmul.f32 %v3652_v31, %v4209_v22  ;;  %v3142_v56 = vsel %vm3141_vm6, %v4063_v38, %v4231_v23 }
 0x938   :  { %3653 = vtanh.f32 %v1211_v28 }
 0x945   :  { %v3654_v33 = vpop.eup %3653 }
 0x946   :  { %v1214_v36 = vmul.f32 %v3654_v33, %v1213_v29 }
 0x948   :  { %v4284_v7 = vadd.f32 %v1215_v60, %v1214_v36 }
 0x94a   :  { %3308 = vmatmul.mubr.msk.f32.vlgmr.msra.gmra.mxu1 %vm118_vm0, %v4284_v7  ;;  %3309 = vmatmul.mubr.msk.f32.vlgmr.msra.gmra.mxu0 %vm118_vm0, %v4284_v7 }
 0x94b   :  { %3483 = vmatpush3.msra.mxu1 %v4053_v34  ;;  %3486 = vmatprep.mubr.msk.f32.mxu1 %vm3933_vm2, %v4578_v19 }
 0x94c   :  { %3484 = vmatprep.subr.mxu1 %v4578_v19  ;;  %1561 = vmatpush1.msra.mxu0 %v4110_v52 }
 0x94d   :  { %3485 = vmatpush3.msra.mxu1 %v4055_v35  ;;  %1562 = vmatprep.subr.mxu0 %v4113_v53 }
 0x94e   :  { %3489 = vmatprep.subr.mxu1 %v4578_v19  ;;  %1563 = vmatpush1.msra.mxu0 %v4118_v54 }
 0x94f   :  { %1564 = vmatprep.subr.mxu0 %v4121_v55  ;;  %1600 = vmatprep.mubr.f32.mxu0 %v4578_v19 }
 0x950   :  { %1565 = vmatpush1.msra.mxu0 %v4138_v61 }
 0x951   :  { %1566 = vmatprep.subr.mxu0 %v4144_v63 }
 0x952   :  { %1567 = vmatpush1.msra.mxu0 %v4148_v1 }
 0x953   :  { %1725 = vmatprep.subr.mxu0 %v4004_v2 }
 0xa0a   :  { %v1286_v51 = vpop.f32.mrf.mxu1 }
 0xa0b   :  { %v1366_v22 = vrot.slane %v1286_v51, 6 }
 0xa0c   :  { %v1288_v38 = vpop.f32.mrf.mxu1 }
 0xa0d   :  { %v1368_v13 = vadd.f32 %v1366_v22, %v4050_v25 }
 0xa0f   :  { %v1370_v17 = vsel %vm1369_vm5, %v1368_v13, -inf }
 0xa10   :  { %1371 = vmax.xlane.f32.xlu0 %v1370_v17  ;;  %v1357_v17 = vpop.f32.mrf.mxu0 }
 0xa99   :  { %v1372_v21 = vpop.xlane.xlu0 %1371 }
 0xa9a   :  { %v1373_v9 = vsub.f32 %v1368_v13, %v1372_v21  ;;  %v4579_v13 = vld [vmem:[#allocation20_spill] sm:$0xff]  ;;  %v1359_v21 = vpop.f32.mrf.mxu0 }
 0xa9c   :  { %v1374_v20 = vmul.f32 1.442695, %v1373_v9 }
 0xa9e   :  { %3655 = vpow2.f32 %v1374_v20 }
 0xaab   :  { %v3656_v18 = vpop.eup %3655 }
 0xaac   :  { %v1376_v27 = vsel %vm1369_vm5, %v3656_v18, 0.0 }
 0xaad   :  { %1377 = vadd.xlane.f32.xlu1 %v1376_v27 }
 0xb36   :  { %v1378_v58 = vpop.xlane.xlu1 %1377 }
 0xb37   :  { %3657 = vrcp.f32 %v1378_v58 }
 0xb44   :  { %v3658_v15 = vpop.eup %3657 }
 0xb45   :  { %v1380_v32 = vmul.f32 %v3658_v15, %v3656_v18  ;;  %v1362_v18 = vadd.f32 %v1288_v38, %v4188_v24  ;;  %v1364_v38 = vadd.f32 %v1359_v21, %v4202_v0 }
 0xb47   :  { %v1382_v28 = vrot.slane %v1380_v32, 2  ;;  %v4308_v31 = vsel %vm3143_vm7, %v3142_v56, %v1380_v32 }
 0xb49   :  { %3487 = vmatmul.mubr.msk.f32.vlgmr.msra.gmra.mxu1 %vm391_vm3, %v1382_v28 }
 0xb4a   :  { %3490 = vmatpush3.msra.mxu1 %v4065_v39  ;;  %3497 = vmatprep.mubr.msk.f32.mxu1 %vm3933_vm2, %v4578_v19 }
 0xb4b   :  { %3491 = vmatprep.subr.mxu1 %v4578_v19 }
 0xb4c   :  { %3492 = vmatpush3.msra.mxu1 %v4069_v40 }
 0xb4d   :  { %3493 = vmatprep.subr.mxu1 %v4578_v19 }
 0xb4e   :  { %3494 = vmatpush3.msra.mxu1 %v4075_v41 }
 0xb4f   :  { %3495 = vmatprep.subr.mxu1 %v4578_v19 }
 0xb50   :  { %3496 = vmatpush3.msra.mxu1 %v4081_v42 }
 0xb51   :  { %3500 = vmatprep.subr.mxu1 %v4578_v19 }
 0xc09   :  { %v1451_v23 = vpop.f32.mrf.mxu1 }
 0xc0a   :  { %3498 = vmatmul.mubr.msk.f32.vlgmr.msra.gmra.mxu1 %vm118_vm0, %v1451_v23  ;;  %v1363_v23 = vadd.f32 %v1357_v17, %v4197_v37 }
 0xc0b   :  { %v3488_v29 = vpop.f32.mrf.mxu1  ;;  %3501 = vmatpush3.msra.mxu1 %v4127_v57  ;;  %3508 = vmatprep.mubr.msk.f32.mxu1 %vm3933_vm2, %v4578_v19 }
 0xc0c   :  { %3502 = vmatprep.subr.mxu1 %v4578_v19 }
 0xc0d   :  { %3503 = vmatpush3.msra.mxu1 %v4130_v59 }
 0xc0e   :  { %3504 = vmatprep.subr.mxu1 %v4578_v19 }
 0xc0f   :  { %3505 = vmatpush3.msra.mxu1 %v4140_v62 }
 0xc10   :  { %3506 = vmatprep.subr.mxu1 %v4578_v19 }
 0xc11   :  { %3507 = vmatpush3.msra.mxu1 %v4150_v3 }
 0xc12   :  { %1796 = vmatprep.subr.mxu1 %v4085_v43 }
 0xcca   :  { %v1524_v33 = vpop.f32.mrf.mxu1 }
 0xccb   :  { %v1529_v36 = vrot.slane %v1524_v33, 6 }
 0xccc   :  { %v3499_v60 = vpop.f32.mrf.mxu1 }
 0xccd   :  { %v1531_v51 = vadd.f32 %v1529_v36, %v4158_v11 }
 0xccf   :  { %v1533_v22 = vrot.slane %v1531_v51, 2 }
 0xcd1   :  { %3312 = vmatmul.mubr.msk.f32.vlgmr.msra.gmra.mxu0 %vm118_vm0, %v1533_v22  ;;  %3509 = vmatmul.mubr.msk.f32.vlgmr.msra.gmra.mxu1 %vm118_vm0, %v1533_v22 }
 0xcd2   :  { %1726 = vmatpush1.msra.mxu0 %v4007_v4  ;;  %1797 = vmatpush1.msra.mxu1 %v4087_v44 }
 0xcd3   :  { %1727 = vmatprep.subr.mxu0 %v4009_v6  ;;  %1798 = vmatprep.subr.mxu1 %v4089_v45 }
 0xcd4   :  { %1728 = vmatpush1.msra.mxu0 %v4012_v8  ;;  %1799 = vmatpush1.msra.mxu1 %v4092_v46 }
 0xcd5   :  { %1729 = vmatprep.subr.mxu0 %v4015_v10  ;;  %1800 = vmatprep.subr.mxu1 %v4095_v47 }
 0xcd6   :  { %1730 = vmatpush1.msra.mxu0 %v4017_v12  ;;  %1801 = vmatpush1.msra.mxu1 %v4098_v48 }
 0xcd7   :  { %1731 = vmatprep.subr.mxu0 %v4020_v14  ;;  %1802 = vmatprep.subr.mxu1 %v4101_v49 }
 0xcd8   :  { %1732 = vmatpush1.msra.mxu0 %v4023_v16  ;;  %1765 = vmatprep.mubr.f32.mxu0 %v4578_v19 }
 0xcd9   :  { %1803 = vmatpush1.msra.mxu1 %v4104_v50  ;;  %1836 = vmatprep.mubr.f32.mxu1 %v4578_v19 }
 0xcda   :  { %3511 = vmatprep.subr.mxu0 %v4578_v19  ;;  %2041 = vmatprep.subr.mxu1 %v4579_v13 }
 0xd91   :  { %v1602_v9 = vpop.f32.mrf.mxu0  ;;  %v1673_v20 = vpop.f32.mrf.mxu1 }
 0xd92   :  { %v1603_v27 = vadd.f32 %v1602_v9, %v4191_v26 }
 0xd93   :  { %v1604_v58 = vpop.f32.mrf.mxu0  ;;  %v3510_v15 = vpop.f32.mrf.mxu1 }
 0xd94   :  { %v1677_v32 = vadd.f32 %v1603_v27, %v1362_v18  ;;  %v1605_v28 = vadd.f32 %v1604_v58, %v4193_v30  ;;  %v1674_v15 = vadd.f32 %v1673_v20, %v4204_v5 }
 0xd96   :  { %v3314_v56 = vmul.f32 -1.442695, %v1677_v32  ;;  %v1684_v29 = vadd.f32 %v1605_v28, %v1363_v23 }
 0xd98   :  { %3659 = vpow2.f32 %v3314_v56  ;;  %v3315_v33 = vmul.f32 -1.442695, %v1684_v29 }
 0xd9a   :  { %3661 = vpow2.f32 %v3315_v33 }
 0xda5   :  { %v3660_v36 = vpop.eup %3659 }
 0xda6   :  { %v1681_v60 = vadd.f32 1.0, %v3660_v36 }
 0xda7   :  { %v3662_v51 = vpop.eup %3661 }
 0xda8   :  { %3663 = vrcp.f32 %v1681_v60  ;;  %v1688_v22 = vadd.f32 1.0, %v3662_v51 }
 0xdaa   :  { %3665 = vrcp.f32 %v1688_v22 }
 0xdb5   :  { %v3664_v9 = vpop.eup %3663 }
 0xdb6   :  { %v1691_v18 = vmul.f32 %v3664_v9, %v1364_v38 }
 0xdb7   :  { %v3666_v58 = vpop.eup %3665 }
 0xdb8   :  { %v1692_v27 = vadd.f32 %v1691_v18, %v1674_v15  ;;  %v1694_v17 = vsub.f32 1.0, %v3666_v58  ;;  %v1696_v28 = vmul.f32 %v3666_v58, %v4284_v7 }
 0xdba   :  { %3667 = vtanh.f32 %v1692_v27 }
 0xdc7   :  { %v3668_v32 = vpop.eup %3667 }
 0xdc8   :  { %v1695_v56 = vmul.f32 %v3668_v32, %v1694_v17 }
 0xdca   :  { %v4360_v23 = vadd.f32 %v1696_v28, %v1695_v56 }
 0xdcc   :  { %3316 = vmatmul.mubr.msk.f32.vlgmr.msra.gmra.mxu0 %vm118_vm0, %v4360_v23  ;;  %3317 = vmatmul.mubr.msk.f32.vlgmr.msra.gmra.mxu1 %vm118_vm0, %v4360_v23 }
 0xdcd   :  { %3512 = vmatpush3.msra.mxu0 %v4053_v34  ;;  %3515 = vmatprep.mubr.msk.f32.mxu0 %vm3933_vm2, %v4578_v19 }
 0xdce   :  { %3513 = vmatprep.subr.mxu0 %v4578_v19  ;;  %2042 = vmatpush1.msra.mxu1 %v4110_v52 }
 0xdcf   :  { %3514 = vmatpush3.msra.mxu0 %v4055_v35  ;;  %2043 = vmatprep.subr.mxu1 %v4113_v53 }
 0xdd0   :  { %3518 = vmatprep.subr.mxu0 %v4578_v19  ;;  %2044 = vmatpush1.msra.mxu1 %v4118_v54 }
 0xdd1   :  { %2045 = vmatprep.subr.mxu1 %v4121_v55  ;;  %2081 = vmatprep.mubr.f32.mxu1 %v4578_v19 }
 0xdd2   :  { %2046 = vmatpush1.msra.mxu1 %v4138_v61 }
 0xdd3   :  { %2047 = vmatprep.subr.mxu1 %v4144_v63 }
 0xdd4   :  { %2048 = vmatpush1.msra.mxu1 %v4148_v1 }
 0xdd5   :  { %2206 = vmatprep.subr.mxu1 %v4004_v2 }
 0xe8c   :  { %v1767_v7 = vpop.f32.mrf.mxu0 }
 0xe8d   :  { %v1847_v21 = vrot.slane %v1767_v7, 5 }
 0xe8f   :  { %v1849_v20 = vadd.f32 %v1847_v21, %v4050_v25 }
 0xe91   :  { %v1851_v29 = vsel %vm1850_vm8, %v1849_v20, -inf }
 0xe92   :  { %1852 = vmax.xlane.f32.xlu0 %v1851_v29 }
 0xf1b   :  { %v1853_v33 = vpop.xlane.xlu0 %1852 }
 0xf1c   :  { %v1854_v36 = vsub.f32 %v1849_v20, %v1853_v33 }
 0xf1e   :  { %v1855_v60 = vmul.f32 1.442695, %v1854_v36 }
 0xf20   :  { %3669 = vpow2.f32 %v1855_v60 }
 0xf2d   :  { %v3670_v51 = vpop.eup %3669 }
 0xf2e   :  { %v1857_v22 = vsel %vm1850_vm8, %v3670_v51, 0.0 }
 0xf2f   :  { %1858 = vadd.xlane.f32.xlu1 %v1857_v22 }
 0xfb8   :  { %v1859_v38 = vpop.xlane.xlu1 %1858 }
 0xfb9   :  { %3671 = vrcp.f32 %v1859_v38 }
 0xfc6   :  { %v3672_v9 = vpop.eup %3671 }
 0xfc7   :  { %v1861_v15 = vmul.f32 %v3672_v9, %v3670_v51 }
 0xfc9   :  { %v1863_v2 = vrot.slane %v1861_v15, 3  ;;  %v4383_v18 = vsel %vm3145_vm9, %v4308_v31, %v1861_v15  ;;  %v1769_v31 = vpop.f32.mrf.mxu0 }
 0xfcb   :  { %3516 = vmatmul.mubr.msk.f32.vlgmr.msra.gmra.mxu0 %vm391_vm3, %v1863_v2 }
 0xfcc   :  { %3519 = vmatpush3.msra.mxu0 %v4065_v39  ;;  %3526 = vmatprep.mubr.msk.f32.mxu0 %vm3933_vm2, %v4578_v19 }
 0xfcd   :  { %3520 = vmatprep.subr.mxu0 %v4578_v19 }
 0xfce   :  { %3521 = vmatpush3.msra.mxu0 %v4069_v40 }
 0xfcf   :  { %3522 = vmatprep.subr.mxu0 %v4578_v19 }
 0xfd0   :  { %3523 = vmatpush3.msra.mxu0 %v4075_v41 }
 0xfd1   :  { %3524 = vmatprep.subr.mxu0 %v4578_v19 }
 0xfd2   :  { %3525 = vmatpush3.msra.mxu0 %v4081_v42 }
 0xfd3   :  { %3529 = vmatprep.subr.mxu0 %v4578_v19 }
0x108b   :  { %v1932_v27 = vpop.f32.mrf.mxu0 }
0x108c   :  { %3527 = vmatmul.mubr.msk.f32.vlgmr.msra.gmra.mxu0 %vm118_vm0, %v1932_v27 }
0x108d   :  { %v3517_v39 = vpop.f32.mrf.mxu0  ;;  %3530 = vmatpush3.msra.mxu0 %v4127_v57  ;;  %3537 = vmatprep.mubr.msk.f32.mxu0 %vm3933_vm2, %v4578_v19 }
0x108e   :  { %3531 = vmatprep.subr.mxu0 %v4578_v19  ;;  %v4460_v39 = vld [vmem:[#allocation10 + $0x78] sm:$0xff] }
0x108f   :  { %3532 = vmatpush3.msra.mxu0 %v4130_v59 }
0x1090   :  { %3533 = vmatprep.subr.mxu0 %v4578_v19 }
0x1091   :  { %3534 = vmatpush3.msra.mxu0 %v4140_v62 }
0x1092   :  { %3535 = vmatprep.subr.mxu0 %v4578_v19 }
0x1093   :  { %3536 = vmatpush3.msra.mxu0 %v4150_v3 }
0x1094   :  { %2277 = vmatprep.subr.mxu0 %v4085_v43 }
0x114c   :  { %v2005_v40 = vpop.f32.mrf.mxu0 }
0x114d   :  { %v2010_v41 = vrot.slane %v2005_v40, 5  ;;  %v4466_v40 = vld [vmem:[#allocation10 + $0x50] sm:$0xff] }
0x114e   :  { %v3528_v42 = vpop.f32.mrf.mxu0 }
0x114f   :  { %v2012_v58 = vadd.f32 %v2010_v41, %v4158_v11  ;;  %v4470_v41 = vld [vmem:[#allocation10 + $0x28] sm:$0xff] }
0x1151   :  { %v2014_v17 = vrot.slane %v2012_v58, 3 }
0x1153   :  { %3320 = vmatmul.mubr.msk.f32.vlgmr.msra.gmra.mxu1 %vm118_vm0, %v2014_v17  ;;  %3538 = vmatmul.mubr.msk.f32.vlgmr.msra.gmra.mxu0 %vm118_vm0, %v2014_v17 }
0x1154   :  { %2207 = vmatpush1.msra.mxu1 %v4007_v4  ;;  %2278 = vmatpush1.msra.mxu0 %v4087_v44  ;;  %v1838_v4 = vpop.f32.mrf.mxu1 }
0x1155   :  { %2208 = vmatprep.subr.mxu1 %v4009_v6  ;;  %2279 = vmatprep.subr.mxu0 %v4089_v45 }
0x1156   :  { %2209 = vmatpush1.msra.mxu1 %v4012_v8  ;;  %2280 = vmatpush1.msra.mxu0 %v4092_v46  ;;  %v1840_v6 = vpop.f32.mrf.mxu1 }
0x1157   :  { %2210 = vmatprep.subr.mxu1 %v4015_v10  ;;  %2281 = vmatprep.subr.mxu0 %v4095_v47  ;;  %v1844_v47 = vadd.f32 %v1838_v4, %v4197_v37  ;;  %v1845_v28 = vadd.f32 %v1840_v6, %v4202_v0  ;;  %v3720_v4 = vld [vmem:[#allocation8 + $0x78] sm:$0xff] }
0x1158   :  { %2211 = vmatpush1.msra.mxu1 %v4017_v12  ;;  %2282 = vmatpush1.msra.mxu0 %v4098_v48  ;;  %v1843_v12 = vadd.f32 %v1769_v31, %v4188_v24 }
0x1159   :  { %2212 = vmatprep.subr.mxu1 %v4020_v14  ;;  %2283 = vmatprep.subr.mxu0 %v4101_v49 }
0x115a   :  { %2213 = vmatpush1.msra.mxu1 %v4023_v16  ;;  %2246 = vmatprep.mubr.f32.mxu1 %v4578_v19 }
0x115b   :  { %2284 = vmatpush1.msra.mxu0 %v4104_v50  ;;  %2317 = vmatprep.mubr.f32.mxu0 %v4578_v19 }
0x115c   :  { %3540 = vmatprep.subr.mxu1 %v4578_v19  ;;  %2522 = vmatprep.subr.mxu0 %v4579_v13 }
0x1213   :  { %v2083_v8 = vpop.f32.mrf.mxu1  ;;  %v2154_v10 = vpop.f32.mrf.mxu0 }
0x1214   :  { %v2084_v14 = vadd.f32 %v2083_v8, %v4191_v26  ;;  %v2155_v21 = vadd.f32 %v2154_v10, %v4204_v5 }
0x1215   :  { %v2085_v43 = vpop.f32.mrf.mxu1  ;;  %v3539_v16 = vpop.f32.mrf.mxu0 }
0x1216   :  { %v2158_v44 = vadd.f32 %v2084_v14, %v1843_v12  ;;  %v2086_v46 = vadd.f32 %v2085_v43, %v4193_v30  ;;  %v3722_v14 = vld [vmem:[#allocation8 + $0x70] sm:$0xff]  ;;  %v3724_v43 = vld [vmem:[#allocation8 + $0x58] sm:$0xff] }
0x1217   :  { %v3726_v16 = vld [vmem:[#allocation8 + $0x50] sm:$0xff] }
0x1218   :  { %v3322_v45 = vmul.f32 -1.442695, %v2158_v44  ;;  %v2165_v48 = vadd.f32 %v2086_v46, %v1844_v47  ;;  %v3727_v44 = vld [vmem:[#allocation8 + $0x28] sm:$0xff]  ;;  %v3729_v46 = vld [vmem:[#allocation8 + $0x20] sm:$0xff]  ;;  %v3730_v47 = vld [vmem:[#allocation8 + $0x30] sm:$0xff] }
0x121a   :  { %3673 = vpow2.f32 %v3322_v45  ;;  %v3323_v49 = vmul.f32 -1.442695, %v2165_v48  ;;  %v3728_v45 = vld [vmem:[#allocation8 + $0x38] sm:$0xff]  ;;  %v3731_v48 = vld [vmem:[#allocation8 + $0x8] sm:$0xff] }
0x121c   :  { %3675 = vpow2.f32 %v3323_v49  ;;  %v3732_v49 = vld [vmem:[#allocation8 + $0x18] sm:$0xff] }
0x1227   :  { %v3674_v50 = vpop.eup %3673 }
0x1228   :  { %v2162_v13 = vadd.f32 1.0, %v3674_v50  ;;  %v3733_v50 = vld [vmem:[#allocation8] sm:$0xff] }
0x1229   :  { %v3676_v32 = vpop.eup %3675 }
0x122a   :  { %3677 = vrcp.f32 %v2162_v13  ;;  %v2169_v56 = vadd.f32 1.0, %v3676_v32  ;;  %v3734_v13 = vld [vmem:[#allocation8 + $0x10] sm:$0xff]  ;;  %v3735_v32 = vld [vmem:[#allocation10 + $0x88] sm:$0xff] }
0x122c   :  { %3679 = vrcp.f32 %v2169_v56 }
0x1237   :  { %v3678_v7 = vpop.eup %3677 }
0x1238   :  { %v2172_v20 = vmul.f32 %v3678_v7, %v1845_v28 }
0x1239   :  { %v3680_v33 = vpop.eup %3679 }
0x123a   :  { %v2173_v29 = vadd.f32 %v2172_v20, %v2155_v21  ;;  %v2175_v36 = vsub.f32 1.0, %v3680_v33  ;;  %v2177_v22 = vmul.f32 %v3680_v33, %v4360_v23 }
0x123c   :  { %3681 = vtanh.f32 %v2173_v29 }
0x1249   :  { %v3682_v60 = vpop.eup %3681 }
0x124a   :  { %v2176_v51 = vmul.f32 %v3682_v60, %v2175_v36 }
0x124c   :  { %v4435_v38 = vadd.f32 %v2177_v22, %v2176_v51 }
0x124e   :  { %3324 = vmatmul.mubr.msk.f32.vlgmr.msra.gmra.mxu1 %vm118_vm0, %v4435_v38  ;;  %3325 = vmatmul.mubr.msk.f32.vlgmr.msra.gmra.mxu0 %vm118_vm0, %v4435_v38 }
0x124f   :  { %3541 = vmatpush3.msra.mxu1 %v4053_v34  ;;  %3544 = vmatprep.mubr.msk.f32.mxu1 %vm3933_vm2, %v4578_v19  ;;  %v3715_v34 = vld [vmem:[#allocation8 + $0x68] sm:$0xff] }
0x1250   :  { %3542 = vmatprep.subr.mxu1 %v4578_v19  ;;  %2523 = vmatpush1.msra.mxu0 %v4110_v52 }
0x1251   :  { %3543 = vmatpush3.msra.mxu1 %v4055_v35  ;;  %2524 = vmatprep.subr.mxu0 %v4113_v53 }
0x1252   :  { %3547 = vmatprep.subr.mxu1 %v4578_v19  ;;  %2525 = vmatpush1.msra.mxu0 %v4118_v54 }
0x1253   :  { %2526 = vmatprep.subr.mxu0 %v4121_v55  ;;  %2562 = vmatprep.mubr.f32.mxu0 %v4578_v19 }
0x1254   :  { %2527 = vmatpush1.msra.mxu0 %v4138_v61 }
0x1255   :  { %2528 = vmatprep.subr.mxu0 %v4144_v63 }
0x1256   :  { %2529 = vmatpush1.msra.mxu0 %v4148_v1 }
0x1257   :  { %2687 = vmatprep.subr.mxu0 %v3715_v34 }
0x130e   :  { %v2248_v52 = vpop.f32.mrf.mxu1  ;;  %v2319_v56 = vpop.f32.mrf.mxu0 }
0x130f   :  { %v2328_v35 = vrot.slane %v2248_v52, 4  ;;  %v2325_v34 = vadd.f32 %v2319_v56, %v4197_v37 }
0x1310   :  { %v2250_v42 = vpop.f32.mrf.mxu1  ;;  %v2321_v28 = vpop.f32.mrf.mxu0 }
0x1311   :  { %v2330_v53 = vadd.f32 %v2328_v35, %v4050_v25  ;;  %v2324_v20 = vadd.f32 %v2250_v42, %v4188_v24 }
0x1313   :  { %v2332_v23 = vsel %vm2331_vm10, %v2330_v53, -inf }
0x1314   :  { %2333 = vmax.xlane.f32.xlu0 %v2332_v23 }
0x139d   :  { %v2334_v54 = vpop.xlane.xlu0 %2333 }
0x139e   :  { %v2335_v9 = vsub.f32 %v2330_v53, %v2334_v54 }
0x13a0   :  { %v2336_v55 = vmul.f32 1.442695, %v2335_v9 }
0x13a2   :  { %3683 = vpow2.f32 %v2336_v55  ;;  %v2326_v55 = vadd.f32 %v2321_v28, %v4202_v0 }
0x13af   :  { %v3684_v15 = vpop.eup %3683 }
0x13b0   :  { %v2338_v2 = vsel %vm2331_vm10, %v3684_v15, 0.0 }
0x13b1   :  { %2339 = vadd.xlane.f32.xlu1 %v2338_v2 }
0x143a   :  { %v2340_v61 = vpop.xlane.xlu1 %2339 }
0x143b   :  { %3685 = vrcp.f32 %v2340_v61 }
0x1448   :  { %v3686_v63 = vpop.eup %3685 }
0x1449   :  { %v2342_v1 = vmul.f32 %v3686_v63, %v3684_v15 }
0x144b   :  { %v2344_v31 = vrot.slane %v2342_v1, 4  ;;  %v4457_v27 = vsel %vm3147_vm11, %v4383_v18, %v2342_v1  ;;  %v4474_v18 = vld [vmem:[#allocation10] sm:$0xff] }
0x144d   :  { %3545 = vmatmul.mubr.msk.f32.vlgmr.msra.gmra.mxu1 %vm391_vm3, %v2344_v31 }
0x144e   :  { %3548 = vmatpush3.msra.mxu1 %v4460_v39  ;;  %3555 = vmatprep.mubr.msk.f32.mxu1 %vm3933_vm2, %v4578_v19 }
0x144f   :  { %3549 = vmatprep.subr.mxu1 %v4578_v19 }
0x1450   :  { %3550 = vmatpush3.msra.mxu1 %v4466_v40 }
0x1451   :  { %3551 = vmatprep.subr.mxu1 %v4578_v19 }
0x1452   :  { %3552 = vmatpush3.msra.mxu1 %v4470_v41 }
0x1453   :  { %3553 = vmatprep.subr.mxu1 %v4578_v19 }
0x1454   :  { %3554 = vmatpush3.msra.mxu1 %v4474_v18 }
0x1455   :  { %3558 = vmatprep.subr.mxu1 %v4578_v19 }
0x150d   :  { %v2413_v58 = vpop.f32.mrf.mxu1 }
0x150e   :  { %3556 = vmatmul.mubr.msk.f32.vlgmr.msra.gmra.mxu1 %vm118_vm0, %v2413_v58 }
0x150f   :  { %v3546_v17 = vpop.f32.mrf.mxu1  ;;  %3559 = vmatpush3.msra.mxu1 %v4127_v57  ;;  %3566 = vmatprep.mubr.msk.f32.mxu1 %vm3933_vm2, %v4578_v19 }
0x1510   :  { %3560 = vmatprep.subr.mxu1 %v4578_v19 }
0x1511   :  { %3561 = vmatpush3.msra.mxu1 %v4130_v59  ;;  %v3721_v59 = vld [vmem:[#allocation8 + $0x60] sm:$0xff] }
0x1512   :  { %3562 = vmatprep.subr.mxu1 %v4578_v19 }
0x1513   :  { %3563 = vmatpush3.msra.mxu1 %v4140_v62  ;;  %v3723_v62 = vld [vmem:[#allocation8 + $0x48] sm:$0xff] }
0x1514   :  { %3564 = vmatprep.subr.mxu1 %v4578_v19 }
0x1515   :  { %3565 = vmatpush3.msra.mxu1 %v4150_v3  ;;  %v3725_v3 = vld [vmem:[#allocation8 + $0x40] sm:$0xff] }
0x1516   :  { %2758 = vmatprep.subr.mxu1 %v3720_v4 }
0x15ce   :  { %v2486_v6 = vpop.f32.mrf.mxu1 }
0x15cf   :  { %v2491_v8 = vrot.slane %v2486_v6, 4  ;;  %v3736_v6 = vld [vmem:[#allocation5 + $0x8] sm:$0xff] }
0x15d0   :  { %v3557_v57 = vpop.f32.mrf.mxu1 }
0x15d1   :  { %v2493_v10 = vadd.f32 %v2491_v8, %v4158_v11  ;;  %v3737_v8 = vld [vmem:[#allocation10 + $0x80] sm:$0xff]  ;;  %v3738_v57 = vld [vmem:[#allocation5] sm:$0xff] }
0x15d3   :  { %v2495_v12 = vrot.slane %v2493_v10, 4  ;;  %v3740_v10 = vld [vmem:[#allocation10 + $0x58] sm:$0xff] }
0x15d5   :  { %3328 = vmatmul.mubr.msk.f32.vlgmr.msra.gmra.mxu0 %vm118_vm0, %v2495_v12  ;;  %3567 = vmatmul.mubr.msk.f32.vlgmr.msra.gmra.mxu1 %vm118_vm0, %v2495_v12  ;;  %v3741_v12 = vld [vmem:[#allocation10 + $0x38] sm:$0xff] }
0x15d6   :  { %2688 = vmatpush1.msra.mxu0 %v3721_v59  ;;  %2759 = vmatpush1.msra.mxu1 %v3722_v14  ;;  %v3742_v59 = vld [vmem:[#allocation10 + $0x30] sm:$0xff] }
0x15d7   :  { %2689 = vmatprep.subr.mxu0 %v3723_v62  ;;  %2760 = vmatprep.subr.mxu1 %v3724_v43  ;;  %v3743_v14 = vld [vmem:[#allocation10 + $0x10] sm:$0xff]  ;;  %v3744_v62 = vld [vmem:[#allocation10 + $0x8] sm:$0xff] }
0x15d8   :  { %2690 = vmatpush1.msra.mxu0 %v3725_v3  ;;  %2761 = vmatpush1.msra.mxu1 %v3726_v16 }
0x15d9   :  { %2691 = vmatprep.subr.mxu0 %v3727_v44  ;;  %2762 = vmatprep.subr.mxu1 %v3728_v45 }
0x15da   :  { %2692 = vmatpush1.msra.mxu0 %v3729_v46  ;;  %2763 = vmatpush1.msra.mxu1 %v3730_v47 }
0x15db   :  { %2693 = vmatprep.subr.mxu0 %v3731_v48  ;;  %2764 = vmatprep.subr.mxu1 %v3732_v49 }
0x15dc   :  { %2694 = vmatpush1.msra.mxu0 %v3733_v50  ;;  %2727 = vmatprep.mubr.f32.mxu0 %v4578_v19 }
0x15dd   :  { %2765 = vmatpush1.msra.mxu1 %v3734_v13  ;;  %2798 = vmatprep.mubr.f32.mxu1 %v4578_v19 }
0x15de   :  { %3569 = vmatprep.subr.mxu0 %v4578_v19  ;;  %3003 = vmatprep.subr.mxu1 %v3735_v32 }
0x1695   :  { %v2564_v7 = vpop.f32.mrf.mxu0  ;;  %v2635_v21 = vpop.f32.mrf.mxu1 }
0x1696   :  { %v2565_v29 = vadd.f32 %v2564_v7, %v4191_v26  ;;  %v2636_v2 = vadd.f32 %v2635_v21, %v4204_v5  ;;  %v3745_v7 = vld [vmem:[#allocation10 + $0x90] sm:$0xff] }
0x1697   :  { %v2566_v33 = vpop.f32.mrf.mxu0  ;;  %v3568_v36 = vpop.f32.mrf.mxu1 }
0x1698   :  { %v2639_v60 = vadd.f32 %v2565_v29, %v2324_v20  ;;  %v2567_v22 = vadd.f32 %v2566_v33, %v4193_v30 }
0x169a   :  { %v3330_v51 = vmul.f32 -1.442695, %v2639_v60  ;;  %v2646_v52 = vadd.f32 %v2567_v22, %v2325_v34  ;;  %v3158_v60 = vld [vmem:[#allocation10 + $0x98] sm:$0xff]  ;;  %v3156_v22 = vld [vmem:[#allocation10 + $0x48] sm:$0xff]  ;;  %v3155_v34 = vld [vmem:[#allocation10 + $0x20] sm:$0xff] }
0x169c   :  { %3687 = vpow2.f32 %v3330_v51  ;;  %v3331_v35 = vmul.f32 -1.442695, %v2646_v52  ;;  %v3157_v51 = vld [vmem:[#allocation10 + $0x70] sm:$0xff] }
0x169e   :  { %3689 = vpow2.f32 %v3331_v35 }
0x16a9   :  { %v3688_v53 = vpop.eup %3687 }
0x16aa   :  { %v2643_v23 = vadd.f32 1.0, %v3688_v53 }
0x16ab   :  { %v3690_v54 = vpop.eup %3689 }
0x16ac   :  { %3691 = vrcp.f32 %v2643_v23  ;;  %v2650_v9 = vadd.f32 1.0, %v3690_v54 }
0x16ae   :  { %3693 = vrcp.f32 %v2650_v9 }
0x16b9   :  { %v3692_v15 = vpop.eup %3691 }
0x16ba   :  { %v2653_v61 = vmul.f32 %v3692_v15, %v2326_v55 }
0x16bb   :  { %v3694_v1 = vpop.eup %3693 }
0x16bc   :  { %v2654_v63 = vadd.f32 %v2653_v61, %v2636_v2  ;;  %v2656_v31 = vsub.f32 1.0, %v3694_v1  ;;  %v2658_v17 = vmul.f32 %v3694_v1, %v4435_v38  ;;  %v3739_v38 = vld [vmem:[#allocation10 + $0x60] sm:$0xff] }
0x16be   :  { %3695 = vtanh.f32 %v2654_v63 }
0x16cb   :  { %v3696_v42 = vpop.eup %3695 }
0x16cc   :  { %v2657_v58 = vmul.f32 %v3696_v42, %v2656_v31 }
0x16ce   :  { %v4501_v4 = vadd.f32 %v2658_v17, %v2657_v58 }
0x16d0   :  { %3332 = vmatmul.mubr.msk.f32.vlgmr.msra.gmra.mxu0 %vm118_vm0, %v4501_v4  ;;  %3333 = vmatmul.mubr.msk.f32.vlgmr.msra.gmra.mxu1 %vm118_vm0, %v4501_v4 }
0x16d1   :  { %3570 = vmatpush3.msra.mxu0 %v3736_v6  ;;  %3573 = vmatprep.mubr.msk.f32.mxu0 %vm3933_vm2, %v4578_v19 }
0x16d2   :  { %3571 = vmatprep.subr.mxu0 %v4578_v19  ;;  %3004 = vmatpush1.msra.mxu1 %v3737_v8 }
0x16d3   :  { %3572 = vmatpush3.msra.mxu0 %v3738_v57  ;;  %3005 = vmatprep.subr.mxu1 %v3739_v38 }
0x16d4   :  { %3576 = vmatprep.subr.mxu0 %v4578_v19  ;;  %3006 = vmatpush1.msra.mxu1 %v3740_v10 }
0x16d5   :  { %3007 = vmatprep.subr.mxu1 %v3741_v12  ;;  %3043 = vmatprep.mubr.f32.mxu1 %v4578_v19 }
0x16d6   :  { %3008 = vmatpush1.msra.mxu1 %v3742_v59 }
0x16d7   :  { %3009 = vmatprep.subr.mxu1 %v3743_v14 }
0x16d8   :  { %3010 = vmatpush1.msra.mxu1 %v3744_v62 }
0x16d9   :  { %3598 = vmatprep.subr.mxu1 %v4578_v19 }
0x1790   :  { %v2729_v43 = vpop.f32.mrf.mxu0 }
0x1791   :  { %v2809_v3 = vrot.slane %v2729_v43, 3 }
0x1793   :  { %v2811_v16 = vadd.f32 %v2809_v3, %v4050_v25  ;;  %v2731_v25 = vpop.f32.mrf.mxu0 }
0x1794   :  { %v2805_v23 = vadd.f32 %v2731_v25, %v4188_v24 }
0x1795   :  { %v2813_v44 = vsel %vm2812_vm12, %v2811_v16, -inf }
0x1796   :  { %2814 = vmax.xlane.f32.xlu0 %v2813_v44 }
0x181f   :  { %v2815_v45 = vpop.xlane.xlu0 %2814 }
0x1820   :  { %v2816_v46 = vsub.f32 %v2811_v16, %v2815_v45 }
0x1822   :  { %v2817_v47 = vmul.f32 1.442695, %v2816_v46 }
0x1824   :  { %3697 = vpow2.f32 %v2817_v47 }
0x1831   :  { %v3698_v48 = vpop.eup %3697 }
0x1832   :  { %v2819_v49 = vsel %vm2812_vm12, %v3698_v48, 0.0 }
0x1833   :  { %2820 = vadd.xlane.f32.xlu1 %v2819_v49 }
0x18bc   :  { %v2821_v50 = vpop.xlane.xlu1 %2820 }
0x18bd   :  { %3699 = vrcp.f32 %v2821_v50 }
0x18ca   :  { %v3700_v13 = vpop.eup %3699 }
0x18cb   :  { %v2823_v32 = vmul.f32 %v3700_v13, %v3698_v48 }
0x18cd   :  { %v2825_v56 = vrot.slane %v2823_v32, 5  ;;  %v3150_v28 = vsel %vm3149_vm13, %v4457_v27, %v2823_v32 }
0x18ce   :  { %3152 = vst.msk [vmem:[#allocation11] sm:$0x3f] %vm3151_vm14, %v3150_v28 }
0x18cf   :  { %3574 = vmatmul.mubr.msk.f32.vlgmr.msra.gmra.mxu0 %vm391_vm3, %v2825_v56 }
0x18d0   :  { %3577 = vmatpush3.msra.mxu0 %v4460_v39  ;;  %3584 = vmatprep.mubr.msk.f32.mxu0 %vm3933_vm2, %v4578_v19 }
0x18d1   :  { %3578 = vmatprep.subr.mxu0 %v4578_v19 }
0x18d2   :  { %3579 = vmatpush3.msra.mxu0 %v4466_v40  ;;  %v3746_v40 = vld [vmem:[#allocation10 + $0x68] sm:$0xff] }
0x18d3   :  { %3580 = vmatprep.subr.mxu0 %v4578_v19 }
0x18d4   :  { %3581 = vmatpush3.msra.mxu0 %v4470_v41  ;;  %v3747_v41 = vld [vmem:[#allocation10 + $0x40] sm:$0xff] }
0x18d5   :  { %3582 = vmatprep.subr.mxu0 %v4578_v19 }
0x18d6   :  { %3583 = vmatpush3.msra.mxu0 %v4474_v18  ;;  %v3748_v18 = vld [vmem:[#allocation10 + $0x18] sm:$0xff] }
0x18d7   :  { %3587 = vmatprep.subr.mxu0 %v4578_v19 }
0x198f   :  { %v2894_v27 = vpop.f32.mrf.mxu0 }
0x1990   :  { %3585 = vmatmul.mubr.msk.f32.vlgmr.msra.gmra.mxu0 %vm118_vm0, %v2894_v27 }
0x1991   :  { %v3575_v39 = vpop.f32.mrf.mxu0  ;;  %3588 = vmatpush3.msra.mxu0 %v3745_v7  ;;  %3595 = vmatprep.mubr.msk.f32.mxu0 %vm3933_vm2, %v4578_v19 }
0x1992   :  { %3589 = vmatprep.subr.mxu0 %v4578_v19 }
0x1993   :  { %3590 = vmatpush3.msra.mxu0 %v3746_v40 }
0x1994   :  { %3591 = vmatprep.subr.mxu0 %v4578_v19 }
0x1995   :  { %3592 = vmatpush3.msra.mxu0 %v3747_v41 }
0x1996   :  { %3593 = vmatprep.subr.mxu0 %v4578_v19 }
0x1997   :  { %3594 = vmatpush3.msra.mxu0 %v3748_v18 }
0x1a50   :  { %v2967_v21 = vpop.f32.mrf.mxu0 }
0x1a51   :  { %v2972_v20 = vrot.slane %v2967_v21, 3 }
0x1a52   :  { %v3586_v29 = vpop.f32.mrf.mxu0 }
0x1a53   :  { %v2974_v33 = vadd.f32 %v2972_v20, %v4158_v11  ;;  %v2800_v11 = vpop.f32.mrf.mxu1 }
0x1a54   :  { %v2806_v63 = vadd.f32 %v2800_v11, %v4197_v37 }
0x1a55   :  { %v2976_v36 = vrot.slane %v2974_v33, 5  ;;  %v2802_v52 = vpop.f32.mrf.mxu1 }
0x1a56   :  { %v2807_v24 = vadd.f32 %v2802_v52, %v4202_v0  ;;  %v3159_v0 = vld [vmem:[%s4569_s6 + $0x8] sm:$0x1] }
0x1a57   :  { %3336 = vmatmul.mubr.msk.f32.vlgmr.msra.gmra.mxu1 %vm118_vm0, %v2976_v36  ;;  %3596 = vmatmul.mubr.msk.f32.vlgmr.msra.gmra.mxu0 %vm118_vm0, %v2976_v36 }
0x1a58   :  { %3606 = vmatprep.mubr.msk.f32.mxu1 %vm3933_vm2, %v4578_v19  ;;  %3599 = vmatpush3.msra.mxu1 %v3158_v60 }
0x1a59   :  { %3600 = vmatprep.subr.mxu1 %v4578_v19 }
0x1a5a   :  { %3601 = vmatpush3.msra.mxu1 %v3157_v51 }
0x1a5b   :  { %3602 = vmatprep.subr.mxu1 %v4578_v19 }
0x1a5c   :  { %3603 = vmatpush3.msra.mxu1 %v3156_v22 }
0x1a5d   :  { %3604 = vmatprep.subr.mxu1 %v4578_v19 }
0x1a5e   :  { %3605 = vmatpush3.msra.mxu1 %v3155_v34 }
0x1b17   :  { %v3045_v35 = vpop.f32.mrf.mxu1  ;;  %v3116_v53 = vpop.f32.mrf.mxu0 }
0x1b18   :  { %v3046_v54 = vadd.f32 %v3045_v35, %v4191_v26  ;;  %v3117_v6 = vadd.f32 %v3116_v53, %v4204_v5 }
0x1b19   :  { %v3047_v9 = vpop.f32.mrf.mxu1  ;;  %v3597_v55 = vpop.f32.mrf.mxu0 }
0x1b1a   :  { %v3120_v15 = vadd.f32 %v3046_v54, %v2805_v23  ;;  %v3048_v61 = vadd.f32 %v3047_v9, %v4193_v30 }
0x1b1c   :  { %v3338_v2 = vmul.f32 -1.442695, %v3120_v15  ;;  %v3127_v1 = vadd.f32 %v3048_v61, %v2806_v63 }
0x1b1e   :  { %3701 = vpow2.f32 %v3338_v2  ;;  %v3339_v19 = vmul.f32 -1.442695, %v3127_v1 }
0x1b20   :  { %3703 = vpow2.f32 %v3339_v19 }
0x1b2b   :  { %v3702_v31 = vpop.eup %3701 }
0x1b2c   :  { %v3124_v42 = vadd.f32 1.0, %v3702_v31 }
0x1b2d   :  { %v3704_v58 = vpop.eup %3703 }
0x1b2e   :  { %3705 = vrcp.f32 %v3124_v42  ;;  %v3131_v17 = vadd.f32 1.0, %v3704_v58 }
0x1b30   :  { %3707 = vrcp.f32 %v3131_v17 }
0x1b3b   :  { %v3706_v26 = vpop.eup %3705 }
0x1b3c   :  { %v3134_v8 = vmul.f32 %v3706_v26, %v2807_v24 }
0x1b3d   :  { %v3708_v30 = vpop.eup %3707 }
0x1b3e   :  { %v3135_v57 = vadd.f32 %v3134_v8, %v3117_v6  ;;  %v3137_v37 = vsub.f32 1.0, %v3708_v30  ;;  %v3139_v12 = vmul.f32 %v3708_v30, %v4501_v4 }
0x1b40   :  { %3709 = vtanh.f32 %v3135_v57 }
0x1b4d   :  { %v3710_v38 = vpop.eup %3709 }
0x1b4e   :  { %v3138_v10 = vmul.f32 %v3710_v38, %v3137_v37 }
0x1b50   :  { %v3140_v59 = vadd.f32 %v3139_v12, %v3138_v10 }
0x1b52   :  { %3607 = vmatmul.mubr.msk.f32.vlgmr.msra.gmra.mxu1 %vm118_vm0, %v3140_v59  ;;  %3154 = vst.msk [vmem:[#allocation14] sm:$0x1] %vm3153_vm15, %v3140_v59 }
0x1c12   :  { %v3229_v5 = vpop.f32.mrf.mxu1 }
0x1c13   :  { %v3230_v14 = vadd.f32 %v3229_v5, %v3159_v0 }
0x1c14   :  { %v3608_v62 = vpop.f32.mrf.mxu1 }
0x1c15   :  { %v3234_v43 = vsel %vm3233_vm1, %v3230_v14, -inf }
0x1c16   :  { %3235 = vmax.xlane.f32.xlu0 %v3234_v43 }
0x1c9f   :  { %v3236_v3 = vpop.xlane.xlu0 %3235 }
0x1ca0   :  { %v3237_v16 = vsub.f32 %v3230_v14, %v3236_v3 }
0x1ca2   :  { %v3238_v44 = vmul.f32 1.442695, %v3237_v16 }
0x1ca4   :  { %3711 = vpow2.f32 %v3238_v44 }
0x1cb1   :  { %v3712_v4 = vpop.eup %3711 }
0x1cb2   :  { %v3240_v45 = vsel %vm3233_vm1, %v3712_v4, 0.0 }
0x1cb3   :  { %3241 = vadd.xlane.f32.xlu1 %v3240_v45 }
0x1cb4   :  { %3860 = shalt.err (!%p3857_p1)
}
0x1cb5   :  { %3256 = dma.vmem_to_hbm [thread:$0]  %s3254_s2, 128, %s4570_s7, [#allocation4]  }
0x1cb6   :  { %s3935_s28 = smov [#allocation12]   ;;  %s3936_s4 = smov [#allocation14]  }
0x1cb7   :  { %s3263_s29 = sshll.u32 %s3935_s28, 4  ;;  %s3273_s30 = sshll.u32 %s3936_s4, 4  ;;  %s3264_s29 = int_to_ptr.vmem [resolvable:$true] %s3263_s29  ;;  %s3274_s30 = int_to_ptr.vmem [resolvable:$true] %s3273_s30 }
0x1cb8   :  { %s3869_s10 = scalar_lea.vmem %s3264_s29, 16  ;;  %s3873_s11 = scalar_lea.vmem %s3264_s29, 32 }
0x1cb9   :  { %p3870_p2 = scmp.ne.s32.totalorder %s3264_s29, %s3869_s10  ;;  %p3874_p3 = scmp.lt.s32.totalorder %s3264_s29, %s3264_s29 }
0x1cba   :  { %p3875_p4 = scmp.lt.s32.totalorder %s3873_s11, %s3869_s10 }
0x1cbc   :  { %p3876_p5 = por %p3875_p4, %p3874_p3 }
0x1cbe   :  { %p3877_p6 = pnand %p3876_p5, %p3870_p2 }
0x1d3c   :  { %v3242_v46 = vpop.xlane.xlu1 %3241 }
0x1d3d   :  { %3713 = vlog2.f32 %v3242_v46 }
0x1d4a   :  { %v3714_v47 = vpop.eup %3713 }
0x1d4b   :  { %v3244_v48 = vmul.f32 0.6931472, %v3714_v47 }
0x1d4d   :  { %v3245_v49 = vsub.f32 %v3237_v16, %v3244_v48 }
0x1d4f   :  { %3246 = vst.msk [vmem:[#allocation12] sm:$0x1] %vm3233_vm1, %v3245_v49 }
0x1d50   :  { %3880 = shalt.err (!%p3877_p6)
}
0x1d51   :  { %3266 = dma.vmem_to_hbm [thread:$0]  %s3264_s29, 16, %s4571_s8, [#allocation13]  }
0x1d52   :  { %s3889_s13 = scalar_lea.vmem %s3274_s30, 16  ;;  %s3893_s14 = scalar_lea.vmem %s3274_s30, 32 }
0x1d53   :  { %p3890_p7 = scmp.ne.s32.totalorder %s3274_s30, %s3889_s13  ;;  %p3894_p8 = scmp.lt.s32.totalorder %s3274_s30, %s3274_s30 }
0x1d54   :  { %p3895_p9 = scmp.lt.s32.totalorder %s3893_s14, %s3889_s13 }
0x1d56   :  { %p3896_p10 = por %p3895_p9, %p3894_p8 }
0x1d58   :  { %p3897_p11 = pnand %p3896_p10, %p3890_p7 }
0x1d5a   :  { %3900 = shalt.err (!%p3897_p11)
}
0x1d5b   :  { %3276 = dma.vmem_to_hbm [thread:$0]  %s3274_s30, 16, %s4572_s9, [#allocation13]  }
0x1d5c   :  { %3915 = dma.done.wait [#allocation4], 128  }
0x1d5d   :  { %3916 = vsyncadd [#allocation4], 4294967168 }
0x1d5e   :  { %3917 = dma.done.wait [#allocation13], 32  }
0x1d5f   :  { %3918 = vsyncadd [#allocation13], 4294967264 }
0x1d60   :  { %3286 = vsyncpa [#allocation3], 1 }
0x1d61   :  { %3287 = vsyncpa [#allocation6], 1 }
0x1d62   :  { %3288 = vsyncpa [#allocation9], 1 }
0x1d63   :  { %3289 = vsyncpa [#allocation4], 1 }
0x1d64   :  { %3290 = vsyncpa [#allocation13], 1 }

</bundles_post_ra>
